<compile_context>
chip_gen: v7x
topology: tpu7x:2x2x1
jax: 0.10.0
libtpu: 0.0.40
codegen_flags: <defaults>
</compile_context>

<pallas_src>
import jax
import jax.numpy as jnp
from jax import lax
from jax.experimental import pallas as pl
from jax.experimental.pallas import tpu as pltpu

# Full-precision f32 matmuls for both the kernel trace and the pure-JAX
# reference (TPU default bf16 matmul passes would otherwise make the
# reference itself the source of mismatch).
jax.config.update("jax_default_matmul_precision", "highest")

BATCH = 2
SEQ_LEN = 8          # config.seq_len
FEATURE_DIM = 4      # required: conv2 in_channels = feature_dim*seq_len must equal 4*seq_len
D_MODEL = 32
N_HEADS = 4
HEAD_DIM = D_MODEL // N_HEADS
BN_EPS = 1e-5


# ----------------------------------------------------------------------------
# Single fused kernel (no grid): attention + W_o + conv1 + reorder + conv2 +
# BN (batch stats) + ReLU + conv3
# ----------------------------------------------------------------------------
def _fused_kernel(x_ref, wqkv_ref, bqkv_ref, wo_ref, bo_ref, w1_ref, b1_ref,
                  w2_ref, b2_ref, gamma_ref, beta_ref, w3_ref, b3_ref, out_ref):
    B, S, D, HD = BATCH, SEQ_LEN, D_MODEL, HEAD_DIM

    # One MXU pass for Q,K,V of the whole (B*S, F) input (Q is pre-scaled on host).
    qkv = jnp.dot(x_ref[...], wqkv_ref[...],
                  preferred_element_type=jnp.float32) + bqkv_ref[...]       # (B*S, 3D)

    # Per-(batch, head) attention; everything static -> fully unrolled,
    # accumulation stays in registers (no VMEM scratch).
    batch_outs = []
    for b in range(B):
        r0 = b * S
        head_outs = []
        for h in range(N_HEADS):
            c0 = h * HD
            qh = qkv[r0:r0 + S, c0:c0 + HD]                                  # (S, hd)
            kh = qkv[r0:r0 + S, D + c0:D + c0 + HD]
            vh = qkv[r0:r0 + S, 2 * D + c0:2 * D + c0 + HD]
            scores = lax.dot_general(qh, kh, (((1,), (1,)), ((), ())),
                                     preferred_element_type=jnp.float32)    # (S, S)
            scores = scores - jnp.max(scores, axis=-1, keepdims=True)
            p = jnp.exp(scores)
            p = p / jnp.sum(p, axis=-1, keepdims=True)                       # exact softmax
            head_outs.append(jnp.dot(p, vh, preferred_element_type=jnp.float32))
        batch_outs.append(jnp.concatenate(head_outs, axis=-1))               # (S, D)
    attn = jnp.concatenate(batch_outs, axis=0)                               # (B*S, D)

    # Output projection + conv1 (1x1) + ReLU.
    o = jnp.dot(attn, wo_ref[...], preferred_element_type=jnp.float32) + bo_ref[...]
    c = jnp.maximum(jnp.dot(o, w1_ref[...], preferred_element_type=jnp.float32)
                    + b1_ref[...], 0.0)                                      # (B*S, 4)

    # Reorder (B*S, 4) -> (B, 4*S) in conv1-channel-major order
    # (equivalent to PyTorch's  (B,4,S).view(B, 4*S, 1)).
    cT = jnp.transpose(c)                                                    # (4, B*S)
    rows = []
    for b in range(B):
        r0 = b * S
        rows.append(jnp.concatenate(
            [cT[ch:ch + 1, r0:r0 + S] for ch in range(4)], axis=1))          # (1, 4*S)
    flat = jnp.concatenate(rows, axis=0)                                     # (B, 4*S)

    # conv2 (1x1) + BatchNorm1d (batch statistics, biased var) + ReLU + conv3.
    y = jnp.dot(flat, w2_ref[...], preferred_element_type=jnp.float32) + b2_ref[...]  # (B, S)
    mean = jnp.mean(y, axis=0, keepdims=True)
    var = jnp.mean((y - mean) ** 2, axis=0, keepdims=True)
    y = (y - mean) * lax.rsqrt(var + BN_EPS)
    y = jnp.maximum(y * gamma_ref[...] + beta_ref[...], 0.0)
    out_ref[...] = jnp.dot(y, w3_ref[...],
                           preferred_element_type=jnp.float32) + b3_ref[...]          # (B, 2)


# ----------------------------------------------------------------------------
# Host-side parameter prep: merge QKV weights, fold in the attention scale.
# ----------------------------------------------------------------------------
def prepare_params(p):
    scale = 1.0 / (HEAD_DIM ** 0.5)
    return dict(
        wqkv=jnp.concatenate([p['wq'] * scale, p['wk'], p['wv']], axis=1),   # (F, 3D)
        bqkv=jnp.concatenate([p['bq'] * scale, p['bk'], p['bv']], axis=1),   # (1, 3D)
        wo=p['wo'], bo=p['bo'],
        w1=p['w1'], b1=p['b1'],
        w2=p['w2'], b2=p['b2'],
        gamma=p['gamma'], beta=p['beta'],
        w3=p['w3'], b3=p['b3'],
    )


# ----------------------------------------------------------------------------
# Wrapper: one pallas_call, whole problem resident in VMEM.
# ----------------------------------------------------------------------------
def multi_head_self_attention(x, fp):
    B, S, F = x.shape
    assert (B, S, F) == (BATCH, SEQ_LEN, FEATURE_DIM)
    x2 = x.reshape(B * S, F)                       # contiguous view, free on host

    vmem = pl.BlockSpec(memory_space=pltpu.MemorySpace.VMEM)
    out = pl.pallas_call(
        _fused_kernel,
        out_shape=jax.ShapeDtypeStruct((B, 2), jnp.float32),
        in_specs=[vmem] * 13,
        out_specs=vmem,
    )(x2, fp['wqkv'], fp['bqkv'], fp['wo'], fp['bo'], fp['w1'], fp['b1'],
      fp['w2'], fp['b2'], fp['gamma'], fp['beta'], fp['w3'], fp['b3'])

    return out.reshape(B, 2, 1)


# ----------------------------------------------------------------------------
# Deterministic parameter init (weights stored pre-transposed for row-major matmul)
# ----------------------------------------------------------------------------
def init_params(key):
    ks = jax.random.split(key, 16)
    D, F, S = D_MODEL, FEATURE_DIM, SEQ_LEN

    def n(k, shape, scale=0.1):
        return scale * jax.random.normal(k, shape, dtype=jnp.float32)

    return dict(
        wq=n(ks[0], (F, D)), bq=n(ks[1], (1, D)),
        wk=n(ks[2], (F, D)), bk=n(ks[3], (1, D)),
        wv=n(ks[4], (F, D)), bv=n(ks[5], (1, D)),
        wo=n(ks[6], (D, D)), bo=n(ks[7], (1, D)),
        w1=n(ks[8], (D, 4)), b1=n(ks[9], (1, 4)),          # conv1 weight^T, bias
        w2=n(ks[10], (4 * S, S)), b2=n(ks[11], (1, S)),    # conv2 weight^T, bias
        gamma=1.0 + n(ks[12], (1, S)), beta=n(ks[13], (1, S)),
        w3=n(ks[14], (S, 2)), b3=n(ks[15], (1, 2)),        # conv3 weight^T, bias
    )


# ----------------------------------------------------------------------------
# Pure-JAX reference (mirrors the PyTorch forward) for a correctness check
# ----------------------------------------------------------------------------
def reference_forward(x, p):
    B, S, F = x.shape
    q = x @ p['wq'] + p['bq']
    k = x @ p['wk'] + p['bk']
    v = x @ p['wv'] + p['bv']

    def split(t):
        return t.reshape(B, S, N_HEADS, HEAD_DIM).transpose(0, 2, 1, 3)

    qh, kh, vh = split(q), split(k), split(v)
    scores = jnp.einsum('bhsd,bhtd->bhst', qh, kh) / (HEAD_DIM ** 0.5)
    probs = jax.nn.softmax(scores, axis=-1)
    o = jnp.einsum('bhst,bhtd->bhsd', probs, vh)
    o = o.transpose(0, 2, 1, 3).reshape(B, S, D_MODEL)
    o = o @ p['wo'] + p['bo']
    o = o.transpose(0, 2, 1)                                          # (B, D, S)
    c = jnp.einsum('co,bcs->bos', p['w1'], o) + p['b1'][0][None, :, None]
    c = jnp.maximum(c, 0.0)                                           # (B, 4, S)
    flat = c.reshape(B, 4 * S)
    y = flat @ p['w2'] + p['b2']                                      # (B, S)
    mean = jnp.mean(y, axis=0, keepdims=True)
    var = jnp.mean((y - mean) ** 2, axis=0, keepdims=True)
    y = (y - mean) / jnp.sqrt(var + BN_EPS) * p['gamma'] + p['beta']
    y = jnp.maximum(y, 0.0)
    out = y @ p['w3'] + p['b3']
    return out.reshape(B, 2, 1)


if __name__ == "__main__":
    key = jax.random.PRNGKey(0)
    pkey, xkey = jax.random.split(key)
    params = init_params(pkey)
    fused_params = prepare_params(params)
    x = jax.random.normal(xkey, (BATCH, SEQ_LEN, FEATURE_DIM), dtype=jnp.float32)

    fwd = jax.jit(multi_head_self_attention)
    out = fwd(x, fused_params)
    out = jax.block_until_ready(out)
    assert out.shape == (BATCH, 2, 1)

    ref = reference_forward(x, params)
    # Tolerance covers the batch-of-2 BatchNorm amplifying (by up to ~1/sqrt(eps))
    # f32 reduction-order differences between the fused kernel and the reference.
    assert jnp.allclose(out, ref, atol=2e-3, rtol=2e-3), "mismatch vs reference"

    print("KERNEL_OK")
</pallas_src>

<mosaic_0001>
module attributes {stable_mosaic.version = 11 : i64} {
  func.func @_fused_kernel(%arg0: memref<16x4xf32, #tpu.memory_space<vmem>>, %arg1: memref<4x96xf32, #tpu.memory_space<vmem>>, %arg2: memref<1x96xf32, #tpu.memory_space<vmem>>, %arg3: memref<32x32xf32, #tpu.memory_space<vmem>>, %arg4: memref<1x32xf32, #tpu.memory_space<vmem>>, %arg5: memref<32x4xf32, #tpu.memory_space<vmem>>, %arg6: memref<1x4xf32, #tpu.memory_space<vmem>>, %arg7: memref<32x8xf32, #tpu.memory_space<vmem>>, %arg8: memref<1x8xf32, #tpu.memory_space<vmem>>, %arg9: memref<1x8xf32, #tpu.memory_space<vmem>>, %arg10: memref<1x8xf32, #tpu.memory_space<vmem>>, %arg11: memref<8x2xf32, #tpu.memory_space<vmem>>, %arg12: memref<1x2xf32, #tpu.memory_space<vmem>>, %arg13: memref<2x2xf32, #tpu.memory_space<vmem>>) attributes {dimension_semantics = [], scalar_prefetch = 0 : i64, scratch_operands = 0 : i64, tpu.core_type = #tpu.core_type<tc>} {
    %c0 = arith.constant 0 : index
    %c0_0 = arith.constant 0 : index
    %0 = vector.load %arg0[%c0, %c0_0] : memref<16x4xf32, #tpu.memory_space<vmem>>, vector<16x4xf32>
    %c0_1 = arith.constant 0 : index
    %c0_2 = arith.constant 0 : index
    %1 = vector.load %arg1[%c0_1, %c0_2] : memref<4x96xf32, #tpu.memory_space<vmem>>, vector<4x96xf32>
    %cst = arith.constant dense<0.000000e+00> : vector<16x96xf32>
    %2 = tpu.matmul %0, %1, %cst {dimension_numbers = #tpu.dot_dimension_numbers<[1], [0], [0], [1], [0, 0, 1, 1], [], []>, precision = #tpu.contract_precision<fp32>} : vector<16x4xf32>, vector<4x96xf32>, vector<16x96xf32> -> vector<16x96xf32>
    %c0_3 = arith.constant 0 : index
    %c0_4 = arith.constant 0 : index
    %3 = vector.load %arg2[%c0_3, %c0_4] : memref<1x96xf32, #tpu.memory_space<vmem>>, vector<1x96xf32>
    %4 = vector.broadcast %3 : vector<1x96xf32> to vector<16x96xf32>
    %5 = arith.addf %2, %4 : vector<16x96xf32>
    %6 = vector.extract_strided_slice %5 {offsets = [0, 0], sizes = [8, 8], strides = [1, 1]} : vector<16x96xf32> to vector<8x8xf32>
    %7 = vector.extract_strided_slice %5 {offsets = [0, 32], sizes = [8, 8], strides = [1, 1]} : vector<16x96xf32> to vector<8x8xf32>
    %8 = vector.extract_strided_slice %5 {offsets = [0, 64], sizes = [8, 8], strides = [1, 1]} : vector<16x96xf32> to vector<8x8xf32>
    %cst_5 = arith.constant dense<0.000000e+00> : vector<8x8xf32>
    %9 = tpu.matmul %6, %7, %cst_5 {dimension_numbers = #tpu.dot_dimension_numbers<[1], [1], [0], [0], [0, 0, 1, 0], [], []>, precision = #tpu.contract_precision<fp32>} : vector<8x8xf32>, vector<8x8xf32>, vector<8x8xf32> -> vector<8x8xf32>
    %cst_6 = arith.constant dense<0xFF800000> : vector<8xf32>
    %10 = vector.multi_reduction <maximumf>, %9, %cst_6 [1] : vector<8x8xf32> to vector<8xf32>
    %11 = vector.shape_cast %10 : vector<8xf32> to vector<8x1xf32>
    %12 = vector.broadcast %11 : vector<8x1xf32> to vector<8x8xf32>
    %13 = arith.subf %9, %12 : vector<8x8xf32>
    %14 = math.exp %13 : vector<8x8xf32>
    %cst_7 = arith.constant dense<0.000000e+00> : vector<8xf32>
    %15 = vector.multi_reduction <add>, %14, %cst_7 [1] : vector<8x8xf32> to vector<8xf32>
    %16 = vector.shape_cast %15 : vector<8xf32> to vector<8x1xf32>
    %17 = vector.broadcast %16 : vector<8x1xf32> to vector<8x8xf32>
    %18 = arith.divf %14, %17 : vector<8x8xf32>
    %cst_8 = arith.constant dense<0.000000e+00> : vector<8x8xf32>
    %19 = tpu.matmul %18, %8, %cst_8 {dimension_numbers = #tpu.dot_dimension_numbers<[1], [0], [0], [1], [0, 0, 1, 1], [], []>, precision = #tpu.contract_precision<fp32>} : vector<8x8xf32>, vector<8x8xf32>, vector<8x8xf32> -> vector<8x8xf32>
    %20 = vector.extract_strided_slice %5 {offsets = [0, 8], sizes = [8, 8], strides = [1, 1]} : vector<16x96xf32> to vector<8x8xf32>
    %21 = vector.extract_strided_slice %5 {offsets = [0, 40], sizes = [8, 8], strides = [1, 1]} : vector<16x96xf32> to vector<8x8xf32>
    %22 = vector.extract_strided_slice %5 {offsets = [0, 72], sizes = [8, 8], strides = [1, 1]} : vector<16x96xf32> to vector<8x8xf32>
    %cst_9 = arith.constant dense<0.000000e+00> : vector<8x8xf32>
    %23 = tpu.matmul %20, %21, %cst_9 {dimension_numbers = #tpu.dot_dimension_numbers<[1], [1], [0], [0], [0, 0, 1, 0], [], []>, precision = #tpu.contract_precision<fp32>} : vector<8x8xf32>, vector<8x8xf32>, vector<8x8xf32> -> vector<8x8xf32>
    %cst_10 = arith.constant dense<0xFF800000> : vector<8xf32>
    %24 = vector.multi_reduction <maximumf>, %23, %cst_10 [1] : vector<8x8xf32> to vector<8xf32>
    %25 = vector.shape_cast %24 : vector<8xf32> to vector<8x1xf32>
    %26 = vector.broadcast %25 : vector<8x1xf32> to vector<8x8xf32>
    %27 = arith.subf %23, %26 : vector<8x8xf32>
    %28 = math.exp %27 : vector<8x8xf32>
    %cst_11 = arith.constant dense<0.000000e+00> : vector<8xf32>
    %29 = vector.multi_reduction <add>, %28, %cst_11 [1] : vector<8x8xf32> to vector<8xf32>
    %30 = vector.shape_cast %29 : vector<8xf32> to vector<8x1xf32>
    %31 = vector.broadcast %30 : vector<8x1xf32> to vector<8x8xf32>
    %32 = arith.divf %28, %31 : vector<8x8xf32>
    %cst_12 = arith.constant dense<0.000000e+00> : vector<8x8xf32>
    %33 = tpu.matmul %32, %22, %cst_12 {dimension_numbers = #tpu.dot_dimension_numbers<[1], [0], [0], [1], [0, 0, 1, 1], [], []>, precision = #tpu.contract_precision<fp32>} : vector<8x8xf32>, vector<8x8xf32>, vector<8x8xf32> -> vector<8x8xf32>
    %34 = vector.extract_strided_slice %5 {offsets = [0, 16], sizes = [8, 8], strides = [1, 1]} : vector<16x96xf32> to vector<8x8xf32>
    %35 = vector.extract_strided_slice %5 {offsets = [0, 48], sizes = [8, 8], strides = [1, 1]} : vector<16x96xf32> to vector<8x8xf32>
    %36 = vector.extract_strided_slice %5 {offsets = [0, 80], sizes = [8, 8], strides = [1, 1]} : vector<16x96xf32> to vector<8x8xf32>
    %cst_13 = arith.constant dense<0.000000e+00> : vector<8x8xf32>
    %37 = tpu.matmul %34, %35, %cst_13 {dimension_numbers = #tpu.dot_dimension_numbers<[1], [1], [0], [0], [0, 0, 1, 0], [], []>, precision = #tpu.contract_precision<fp32>} : vector<8x8xf32>, vector<8x8xf32>, vector<8x8xf32> -> vector<8x8xf32>
    %cst_14 = arith.constant dense<0xFF800000> : vector<8xf32>
    %38 = vector.multi_reduction <maximumf>, %37, %cst_14 [1] : vector<8x8xf32> to vector<8xf32>
    %39 = vector.shape_cast %38 : vector<8xf32> to vector<8x1xf32>
    %40 = vector.broadcast %39 : vector<8x1xf32> to vector<8x8xf32>
    %41 = arith.subf %37, %40 : vector<8x8xf32>
    %42 = math.exp %41 : vector<8x8xf32>
    %cst_15 = arith.constant dense<0.000000e+00> : vector<8xf32>
    %43 = vector.multi_reduction <add>, %42, %cst_15 [1] : vector<8x8xf32> to vector<8xf32>
    %44 = vector.shape_cast %43 : vector<8xf32> to vector<8x1xf32>
    %45 = vector.broadcast %44 : vector<8x1xf32> to vector<8x8xf32>
    %46 = arith.divf %42, %45 : vector<8x8xf32>
    %cst_16 = arith.constant dense<0.000000e+00> : vector<8x8xf32>
    %47 = tpu.matmul %46, %36, %cst_16 {dimension_numbers = #tpu.dot_dimension_numbers<[1], [0], [0], [1], [0, 0, 1, 1], [], []>, precision = #tpu.contract_precision<fp32>} : vector<8x8xf32>, vector<8x8xf32>, vector<8x8xf32> -> vector<8x8xf32>
    %48 = vector.extract_strided_slice %5 {offsets = [0, 24], sizes = [8, 8], strides = [1, 1]} : vector<16x96xf32> to vector<8x8xf32>
    %49 = vector.extract_strided_slice %5 {offsets = [0, 56], sizes = [8, 8], strides = [1, 1]} : vector<16x96xf32> to vector<8x8xf32>
    %50 = vector.extract_strided_slice %5 {offsets = [0, 88], sizes = [8, 8], strides = [1, 1]} : vector<16x96xf32> to vector<8x8xf32>
    %cst_17 = arith.constant dense<0.000000e+00> : vector<8x8xf32>
    %51 = tpu.matmul %48, %49, %cst_17 {dimension_numbers = #tpu.dot_dimension_numbers<[1], [1], [0], [0], [0, 0, 1, 0], [], []>, precision = #tpu.contract_precision<fp32>} : vector<8x8xf32>, vector<8x8xf32>, vector<8x8xf32> -> vector<8x8xf32>
    %cst_18 = arith.constant dense<0xFF800000> : vector<8xf32>
    %52 = vector.multi_reduction <maximumf>, %51, %cst_18 [1] : vector<8x8xf32> to vector<8xf32>
    %53 = vector.shape_cast %52 : vector<8xf32> to vector<8x1xf32>
    %54 = vector.broadcast %53 : vector<8x1xf32> to vector<8x8xf32>
    %55 = arith.subf %51, %54 : vector<8x8xf32>
    %56 = math.exp %55 : vector<8x8xf32>
    %cst_19 = arith.constant dense<0.000000e+00> : vector<8xf32>
    %57 = vector.multi_reduction <add>, %56, %cst_19 [1] : vector<8x8xf32> to vector<8xf32>
    %58 = vector.shape_cast %57 : vector<8xf32> to vector<8x1xf32>
    %59 = vector.broadcast %58 : vector<8x1xf32> to vector<8x8xf32>
    %60 = arith.divf %56, %59 : vector<8x8xf32>
    %cst_20 = arith.constant dense<0.000000e+00> : vector<8x8xf32>
    %61 = tpu.matmul %60, %50, %cst_20 {dimension_numbers = #tpu.dot_dimension_numbers<[1], [0], [0], [1], [0, 0, 1, 1], [], []>, precision = #tpu.contract_precision<fp32>} : vector<8x8xf32>, vector<8x8xf32>, vector<8x8xf32> -> vector<8x8xf32>
    %62 = tpu.concatenate %19, %33, %47, %61 in 1 : vector<8x8xf32>, vector<8x8xf32>, vector<8x8xf32>, vector<8x8xf32> -> vector<8x32xf32>
    %63 = vector.extract_strided_slice %5 {offsets = [8, 0], sizes = [8, 8], strides = [1, 1]} : vector<16x96xf32> to vector<8x8xf32>
    %64 = vector.extract_strided_slice %5 {offsets = [8, 32], sizes = [8, 8], strides = [1, 1]} : vector<16x96xf32> to vector<8x8xf32>
    %65 = vector.extract_strided_slice %5 {offsets = [8, 64], sizes = [8, 8], strides = [1, 1]} : vector<16x96xf32> to vector<8x8xf32>
    %cst_21 = arith.constant dense<0.000000e+00> : vector<8x8xf32>
    %66 = tpu.matmul %63, %64, %cst_21 {dimension_numbers = #tpu.dot_dimension_numbers<[1], [1], [0], [0], [0, 0, 1, 0], [], []>, precision = #tpu.contract_precision<fp32>} : vector<8x8xf32>, vector<8x8xf32>, vector<8x8xf32> -> vector<8x8xf32>
    %cst_22 = arith.constant dense<0xFF800000> : vector<8xf32>
    %67 = vector.multi_reduction <maximumf>, %66, %cst_22 [1] : vector<8x8xf32> to vector<8xf32>
    %68 = vector.shape_cast %67 : vector<8xf32> to vector<8x1xf32>
    %69 = vector.broadcast %68 : vector<8x1xf32> to vector<8x8xf32>
    %70 = arith.subf %66, %69 : vector<8x8xf32>
    %71 = math.exp %70 : vector<8x8xf32>
    %cst_23 = arith.constant dense<0.000000e+00> : vector<8xf32>
    %72 = vector.multi_reduction <add>, %71, %cst_23 [1] : vector<8x8xf32> to vector<8xf32>
    %73 = vector.shape_cast %72 : vector<8xf32> to vector<8x1xf32>
    %74 = vector.broadcast %73 : vector<8x1xf32> to vector<8x8xf32>
    %75 = arith.divf %71, %74 : vector<8x8xf32>
    %cst_24 = arith.constant dense<0.000000e+00> : vector<8x8xf32>
    %76 = tpu.matmul %75, %65, %cst_24 {dimension_numbers = #tpu.dot_dimension_numbers<[1], [0], [0], [1], [0, 0, 1, 1], [], []>, precision = #tpu.contract_precision<fp32>} : vector<8x8xf32>, vector<8x8xf32>, vector<8x8xf32> -> vector<8x8xf32>
    %77 = vector.extract_strided_slice %5 {offsets = [8, 8], sizes = [8, 8], strides = [1, 1]} : vector<16x96xf32> to vector<8x8xf32>
    %78 = vector.extract_strided_slice %5 {offsets = [8, 40], sizes = [8, 8], strides = [1, 1]} : vector<16x96xf32> to vector<8x8xf32>
    %79 = vector.extract_strided_slice %5 {offsets = [8, 72], sizes = [8, 8], strides = [1, 1]} : vector<16x96xf32> to vector<8x8xf32>
    %cst_25 = arith.constant dense<0.000000e+00> : vector<8x8xf32>
    %80 = tpu.matmul %77, %78, %cst_25 {dimension_numbers = #tpu.dot_dimension_numbers<[1], [1], [0], [0], [0, 0, 1, 0], [], []>, precision = #tpu.contract_precision<fp32>} : vector<8x8xf32>, vector<8x8xf32>, vector<8x8xf32> -> vector<8x8xf32>
    %cst_26 = arith.constant dense<0xFF800000> : vector<8xf32>
    %81 = vector.multi_reduction <maximumf>, %80, %cst_26 [1] : vector<8x8xf32> to vector<8xf32>
    %82 = vector.shape_cast %81 : vector<8xf32> to vector<8x1xf32>
    %83 = vector.broadcast %82 : vector<8x1xf32> to vector<8x8xf32>
    %84 = arith.subf %80, %83 : vector<8x8xf32>
    %85 = math.exp %84 : vector<8x8xf32>
    %cst_27 = arith.constant dense<0.000000e+00> : vector<8xf32>
    %86 = vector.multi_reduction <add>, %85, %cst_27 [1] : vector<8x8xf32> to vector<8xf32>
    %87 = vector.shape_cast %86 : vector<8xf32> to vector<8x1xf32>
    %88 = vector.broadcast %87 : vector<8x1xf32> to vector<8x8xf32>
    %89 = arith.divf %85, %88 : vector<8x8xf32>
    %cst_28 = arith.constant dense<0.000000e+00> : vector<8x8xf32>
    %90 = tpu.matmul %89, %79, %cst_28 {dimension_numbers = #tpu.dot_dimension_numbers<[1], [0], [0], [1], [0, 0, 1, 1], [], []>, precision = #tpu.contract_precision<fp32>} : vector<8x8xf32>, vector<8x8xf32>, vector<8x8xf32> -> vector<8x8xf32>
    %91 = vector.extract_strided_slice %5 {offsets = [8, 16], sizes = [8, 8], strides = [1, 1]} : vector<16x96xf32> to vector<8x8xf32>
    %92 = vector.extract_strided_slice %5 {offsets = [8, 48], sizes = [8, 8], strides = [1, 1]} : vector<16x96xf32> to vector<8x8xf32>
    %93 = vector.extract_strided_slice %5 {offsets = [8, 80], sizes = [8, 8], strides = [1, 1]} : vector<16x96xf32> to vector<8x8xf32>
    %cst_29 = arith.constant dense<0.000000e+00> : vector<8x8xf32>
    %94 = tpu.matmul %91, %92, %cst_29 {dimension_numbers = #tpu.dot_dimension_numbers<[1], [1], [0], [0], [0, 0, 1, 0], [], []>, precision = #tpu.contract_precision<fp32>} : vector<8x8xf32>, vector<8x8xf32>, vector<8x8xf32> -> vector<8x8xf32>
    %cst_30 = arith.constant dense<0xFF800000> : vector<8xf32>
    %95 = vector.multi_reduction <maximumf>, %94, %cst_30 [1] : vector<8x8xf32> to vector<8xf32>
    %96 = vector.shape_cast %95 : vector<8xf32> to vector<8x1xf32>
    %97 = vector.broadcast %96 : vector<8x1xf32> to vector<8x8xf32>
    %98 = arith.subf %94, %97 : vector<8x8xf32>
    %99 = math.exp %98 : vector<8x8xf32>
    %cst_31 = arith.constant dense<0.000000e+00> : vector<8xf32>
    %100 = vector.multi_reduction <add>, %99, %cst_31 [1] : vector<8x8xf32> to vector<8xf32>
    %101 = vector.shape_cast %100 : vector<8xf32> to vector<8x1xf32>
    %102 = vector.broadcast %101 : vector<8x1xf32> to vector<8x8xf32>
    %103 = arith.divf %99, %102 : vector<8x8xf32>
    %cst_32 = arith.constant dense<0.000000e+00> : vector<8x8xf32>
    %104 = tpu.matmul %103, %93, %cst_32 {dimension_numbers = #tpu.dot_dimension_numbers<[1], [0], [0], [1], [0, 0, 1, 1], [], []>, precision = #tpu.contract_precision<fp32>} : vector<8x8xf32>, vector<8x8xf32>, vector<8x8xf32> -> vector<8x8xf32>
    %105 = vector.extract_strided_slice %5 {offsets = [8, 24], sizes = [8, 8], strides = [1, 1]} : vector<16x96xf32> to vector<8x8xf32>
    %106 = vector.extract_strided_slice %5 {offsets = [8, 56], sizes = [8, 8], strides = [1, 1]} : vector<16x96xf32> to vector<8x8xf32>
    %107 = vector.extract_strided_slice %5 {offsets = [8, 88], sizes = [8, 8], strides = [1, 1]} : vector<16x96xf32> to vector<8x8xf32>
    %cst_33 = arith.constant dense<0.000000e+00> : vector<8x8xf32>
    %108 = tpu.matmul %105, %106, %cst_33 {dimension_numbers = #tpu.dot_dimension_numbers<[1], [1], [0], [0], [0, 0, 1, 0], [], []>, precision = #tpu.contract_precision<fp32>} : vector<8x8xf32>, vector<8x8xf32>, vector<8x8xf32> -> vector<8x8xf32>
    %cst_34 = arith.constant dense<0xFF800000> : vector<8xf32>
    %109 = vector.multi_reduction <maximumf>, %108, %cst_34 [1] : vector<8x8xf32> to vector<8xf32>
    %110 = vector.shape_cast %109 : vector<8xf32> to vector<8x1xf32>
    %111 = vector.broadcast %110 : vector<8x1xf32> to vector<8x8xf32>
    %112 = arith.subf %108, %111 : vector<8x8xf32>
    %113 = math.exp %112 : vector<8x8xf32>
    %cst_35 = arith.constant dense<0.000000e+00> : vector<8xf32>
    %114 = vector.multi_reduction <add>, %113, %cst_35 [1] : vector<8x8xf32> to vector<8xf32>
    %115 = vector.shape_cast %114 : vector<8xf32> to vector<8x1xf32>
    %116 = vector.broadcast %115 : vector<8x1xf32> to vector<8x8xf32>
    %117 = arith.divf %113, %116 : vector<8x8xf32>
    %cst_36 = arith.constant dense<0.000000e+00> : vector<8x8xf32>
    %118 = tpu.matmul %117, %107, %cst_36 {dimension_numbers = #tpu.dot_dimension_numbers<[1], [0], [0], [1], [0, 0, 1, 1], [], []>, precision = #tpu.contract_precision<fp32>} : vector<8x8xf32>, vector<8x8xf32>, vector<8x8xf32> -> vector<8x8xf32>
    %119 = tpu.concatenate %76, %90, %104, %118 in 1 : vector<8x8xf32>, vector<8x8xf32>, vector<8x8xf32>, vector<8x8xf32> -> vector<8x32xf32>
    %120 = tpu.concatenate %62, %119 in 0 : vector<8x32xf32>, vector<8x32xf32> -> vector<16x32xf32>
    %c0_37 = arith.constant 0 : index
    %c0_38 = arith.constant 0 : index
    %121 = vector.load %arg3[%c0_37, %c0_38] : memref<32x32xf32, #tpu.memory_space<vmem>>, vector<32x32xf32>
    %cst_39 = arith.constant dense<0.000000e+00> : vector<16x32xf32>
    %122 = tpu.matmul %120, %121, %cst_39 {dimension_numbers = #tpu.dot_dimension_numbers<[1], [0], [0], [1], [0, 0, 1, 1], [], []>, precision = #tpu.contract_precision<fp32>} : vector<16x32xf32>, vector<32x32xf32>, vector<16x32xf32> -> vector<16x32xf32>
    %c0_40 = arith.constant 0 : index
    %c0_41 = arith.constant 0 : index
    %123 = vector.load %arg4[%c0_40, %c0_41] : memref<1x32xf32, #tpu.memory_space<vmem>>, vector<1x32xf32>
    %124 = vector.broadcast %123 : vector<1x32xf32> to vector<16x32xf32>
    %125 = arith.addf %122, %124 : vector<16x32xf32>
    %c0_42 = arith.constant 0 : index
    %c0_43 = arith.constant 0 : index
    %126 = vector.load %arg5[%c0_42, %c0_43] : memref<32x4xf32, #tpu.memory_space<vmem>>, vector<32x4xf32>
    %cst_44 = arith.constant dense<0.000000e+00> : vector<16x4xf32>
    %127 = tpu.matmul %125, %126, %cst_44 {dimension_numbers = #tpu.dot_dimension_numbers<[1], [0], [0], [1], [0, 0, 1, 1], [], []>, precision = #tpu.contract_precision<fp32>} : vector<16x32xf32>, vector<32x4xf32>, vector<16x4xf32> -> vector<16x4xf32>
    %c0_45 = arith.constant 0 : index
    %c0_46 = arith.constant 0 : index
    %128 = vector.load %arg6[%c0_45, %c0_46] : memref<1x4xf32, #tpu.memory_space<vmem>>, vector<1x4xf32>
    %129 = vector.broadcast %128 : vector<1x4xf32> to vector<16x4xf32>
    %130 = arith.addf %127, %129 : vector<16x4xf32>
    %cst_47 = arith.constant 0.000000e+00 : f32
    %131 = vector.broadcast %cst_47 : f32 to vector<16x4xf32>
    %132 = arith.maximumf %130, %131 : vector<16x4xf32>
    %133 = tpu.transpose %132, [1, 0] : vector<16x4xf32> -> vector<4x16xf32>
    %134 = vector.extract_strided_slice %133 {offsets = [0, 0], sizes = [1, 8], strides = [1, 1]} : vector<4x16xf32> to vector<1x8xf32>
    %135 = vector.extract_strided_slice %133 {offsets = [1, 0], sizes = [1, 8], strides = [1, 1]} : vector<4x16xf32> to vector<1x8xf32>
    %136 = vector.extract_strided_slice %133 {offsets = [2, 0], sizes = [1, 8], strides = [1, 1]} : vector<4x16xf32> to vector<1x8xf32>
    %137 = vector.extract_strided_slice %133 {offsets = [3, 0], sizes = [1, 8], strides = [1, 1]} : vector<4x16xf32> to vector<1x8xf32>
    %138 = tpu.concatenate %134, %135, %136, %137 in 1 : vector<1x8xf32>, vector<1x8xf32>, vector<1x8xf32>, vector<1x8xf32> -> vector<1x32xf32>
    %139 = vector.extract_strided_slice %133 {offsets = [0, 8], sizes = [1, 8], strides = [1, 1]} : vector<4x16xf32> to vector<1x8xf32>
    %140 = vector.extract_strided_slice %133 {offsets = [1, 8], sizes = [1, 8], strides = [1, 1]} : vector<4x16xf32> to vector<1x8xf32>
    %141 = vector.extract_strided_slice %133 {offsets = [2, 8], sizes = [1, 8], strides = [1, 1]} : vector<4x16xf32> to vector<1x8xf32>
    %142 = vector.extract_strided_slice %133 {offsets = [3, 8], sizes = [1, 8], strides = [1, 1]} : vector<4x16xf32> to vector<1x8xf32>
    %143 = tpu.concatenate %139, %140, %141, %142 in 1 : vector<1x8xf32>, vector<1x8xf32>, vector<1x8xf32>, vector<1x8xf32> -> vector<1x32xf32>
    %144 = tpu.concatenate %138, %143 in 0 : vector<1x32xf32>, vector<1x32xf32> -> vector<2x32xf32>
    %c0_48 = arith.constant 0 : index
    %c0_49 = arith.constant 0 : index
    %145 = vector.load %arg7[%c0_48, %c0_49] : memref<32x8xf32, #tpu.memory_space<vmem>>, vector<32x8xf32>
    %cst_50 = arith.constant dense<0.000000e+00> : vector<2x8xf32>
    %146 = tpu.matmul %144, %145, %cst_50 {dimension_numbers = #tpu.dot_dimension_numbers<[1], [0], [0], [1], [0, 0, 1, 1], [], []>, precision = #tpu.contract_precision<fp32>} : vector<2x32xf32>, vector<32x8xf32>, vector<2x8xf32> -> vector<2x8xf32>
    %c0_51 = arith.constant 0 : index
    %c0_52 = arith.constant 0 : index
    %147 = vector.load %arg8[%c0_51, %c0_52] : memref<1x8xf32, #tpu.memory_space<vmem>>, vector<1x8xf32>
    %148 = vector.broadcast %147 : vector<1x8xf32> to vector<2x8xf32>
    %149 = arith.addf %146, %148 : vector<2x8xf32>
    %cst_53 = arith.constant dense<0.000000e+00> : vector<8xf32>
    %150 = vector.multi_reduction <add>, %149, %cst_53 [0] : vector<2x8xf32> to vector<8xf32>
    %151 = vector.shape_cast %150 : vector<8xf32> to vector<1x8xf32>
    %cst_54 = arith.constant 2.000000e+00 : f32
    %152 = vector.broadcast %cst_54 : f32 to vector<1x8xf32>
    %153 = arith.divf %151, %152 : vector<1x8xf32>
    %154 = vector.broadcast %153 : vector<1x8xf32> to vector<2x8xf32>
    %155 = arith.subf %149, %154 : vector<2x8xf32>
    %156 = arith.mulf %155, %155 : vector<2x8xf32>
    %cst_55 = arith.constant dense<0.000000e+00> : vector<8xf32>
    %157 = vector.multi_reduction <add>, %156, %cst_55 [0] : vector<2x8xf32> to vector<8xf32>
    %158 = vector.shape_cast %157 : vector<8xf32> to vector<1x8xf32>
    %cst_56 = arith.constant 2.000000e+00 : f32
    %159 = vector.broadcast %cst_56 : f32 to vector<1x8xf32>
    %160 = arith.divf %158, %159 : vector<1x8xf32>
    %161 = vector.broadcast %153 : vector<1x8xf32> to vector<2x8xf32>
    %162 = arith.subf %149, %161 : vector<2x8xf32>
    %cst_57 = arith.constant 9.99999974E-6 : f32
    %163 = vector.broadcast %cst_57 : f32 to vector<1x8xf32>
    %164 = arith.addf %160, %163 : vector<1x8xf32>
    %165 = math.rsqrt %164 : vector<1x8xf32>
    %166 = vector.broadcast %165 : vector<1x8xf32> to vector<2x8xf32>
    %167 = arith.mulf %162, %166 : vector<2x8xf32>
    %c0_58 = arith.constant 0 : index
    %c0_59 = arith.constant 0 : index
    %168 = vector.load %arg9[%c0_58, %c0_59] : memref<1x8xf32, #tpu.memory_space<vmem>>, vector<1x8xf32>
    %169 = vector.broadcast %168 : vector<1x8xf32> to vector<2x8xf32>
    %170 = arith.mulf %167, %169 : vector<2x8xf32>
    %c0_60 = arith.constant 0 : index
    %c0_61 = arith.constant 0 : index
    %171 = vector.load %arg10[%c0_60, %c0_61] : memref<1x8xf32, #tpu.memory_space<vmem>>, vector<1x8xf32>
    %172 = vector.broadcast %171 : vector<1x8xf32> to vector<2x8xf32>
    %173 = arith.addf %170, %172 : vector<2x8xf32>
    %cst_62 = arith.constant 0.000000e+00 : f32
    %174 = vector.broadcast %cst_62 : f32 to vector<2x8xf32>
    %175 = arith.maximumf %173, %174 : vector<2x8xf32>
    %c0_63 = arith.constant 0 : index
    %c0_64 = arith.constant 0 : index
    %176 = vector.load %arg11[%c0_63, %c0_64] : memref<8x2xf32, #tpu.memory_space<vmem>>, vector<8x2xf32>
    %cst_65 = arith.constant dense<0.000000e+00> : vector<2x2xf32>
    %177 = tpu.matmul %175, %176, %cst_65 {dimension_numbers = #tpu.dot_dimension_numbers<[1], [0], [0], [1], [0, 0, 1, 1], [], []>, precision = #tpu.contract_precision<fp32>} : vector<2x8xf32>, vector<8x2xf32>, vector<2x2xf32> -> vector<2x2xf32>
    %c0_66 = arith.constant 0 : index
    %c0_67 = arith.constant 0 : index
    %178 = vector.load %arg12[%c0_66, %c0_67] : memref<1x2xf32, #tpu.memory_space<vmem>>, vector<1x2xf32>
    %179 = vector.broadcast %178 : vector<1x2xf32> to vector<2x2xf32>
    %180 = arith.addf %177, %179 : vector<2x2xf32>
    %c0_68 = arith.constant 0 : index
    %c0_69 = arith.constant 0 : index
    %181 = vector.load %arg13[%c0_68, %c0_69] : memref<2x2xf32, #tpu.memory_space<vmem>>, vector<2x2xf32>
    tpu.vector_store %arg13[%c0_68, %c0_69], %180 {strides = array<i32>} : memref<2x2xf32, #tpu.memory_space<vmem>>, vector<2x2xf32>,
    return
  }
}

</mosaic_0001>

<bundles_post_ra>
// kernel: multi_head_self_attention.1
= control target key start
LH: loop header
LB: loop body
LE: loop exit
PB: predicated region body
PF: predicated region fallthrough
CT: control target
= control target key end

     0   :  { %vm62_vm0 = vcmask 1043456   ;;  %vm55_vm1 = vcmask 31744   ;;  %s12317_s0 = inlined_call_operand.vmem [shape: f32[16,4], index: 0, kind: input, shape index: {}]   ;;  %s12318_s1 = inlined_call_operand.vmem [shape: f32[4,96], index: 1, kind: input, shape index: {}]   ;;  %s12319_s2 = inlined_call_operand.vmem [shape: f32[1,96], index: 2, kind: input, shape index: {}]   ;;  %s12320_s3 = inlined_call_operand.vmem [shape: f32[32,32], index: 3, kind: input, shape index: {}]   ;;  %s12321_s4 = inlined_call_operand.vmem [shape: f32[1,32], index: 4, kind: input, shape index: {}]   ;;  %s12322_s5 = inlined_call_operand.vmem [shape: f32[32,4], index: 5, kind: input, shape index: {}]   ;;  %s12323_s6 = inlined_call_operand.vmem [shape: f32[1,4], index: 6, kind: input, shape index: {}]   ;;  %s12324_s7 = inlined_call_operand.vmem [shape: f32[32,8], index: 7, kind: input, shape index: {}]   ;;  %s12325_s8 = inlined_call_operand.vmem [shape: f32[1,8], index: 8, kind: input, shape index: {}]   ;;  %s12326_s9 = inlined_call_operand.vmem [shape: f32[1,8], index: 9, kind: input, shape index: {}]   ;;  %s12327_s10 = inlined_call_operand.vmem [shape: f32[1,8], index: 10, kind: input, shape index: {}]   ;;  %s12328_s11 = inlined_call_operand.vmem [shape: f32[8,2], index: 11, kind: input, shape index: {}]   ;;  %s12329_s12 = inlined_call_operand.vmem [shape: f32[1,2], index: 12, kind: input, shape index: {}]   ;;  %s12330_s13 = inlined_call_operand.hbm [shape: f32[2,2], index: 13, kind: output, shape index: {}]  }
   0x1   :  { %v47_v0 = vld [vmem:[%s12318_s1] sm:$0xf]  ;;  %v46_v2 = vld [vmem:[%s12317_s0 + $0x8] sm:$0xff] }
   0x2   :  { %v45_v1 = vld [vmem:[%s12317_s0] sm:$0xff]  ;;  %v64_v3 = vsel %vm62_vm0, %v47_v0, 0  ;;  %v60_v5 = vsel %vm55_vm1, %v46_v2, 0 }
   0x3   :  { %v57_v4 = vsel %vm55_vm1, %v45_v1, 0  ;;  %v67_v6 = vand.u32 4294901760, %v64_v3  ;;  %v142_v8 = vand.u32 4294901760, %v60_v5 }
   0x4   :  { %v132_v7 = vand.u32 4294901760, %v57_v4 }
   0x5   :  { %18 = vsyncpa [#allocation3], 0  ;;  %10424 = vmatprep.subr.mxu0 %v67_v6  ;;  %v143_v10 = vsub.f32 %v60_v5, %v142_v8  ;;  %v154_v11 = vsub.f32 %v64_v3, %v67_v6  ;;  %v11588_v21 = vmov 0.0   ;;  %vm11589_vm2 = vmmov 0   ;;  %v10093_v22 = vld [vmem:[%s12319_s2] ss:$0 sm:$0xff] }
   0x6   :  { %v133_v9 = vsub.f32 %v57_v4, %v132_v7  ;;  %10425 = vmatpush3.msra.mxu0 %v67_v6  ;;  %10454 = vmatprep.subr.mxu1 %v11588_v21  ;;  %s11590_s14 = smov 88   ;;  %s11591_s15 = smov 96   ;;  %vm558_vm3 = vcmask 64512   ;;  %vm4236_vm4 = vcmask 130048   ;;  %vm4238_vm5 = vcmask 195584  }
   0x7   :  { %v144_v13 = vand.u32 4294901760, %v143_v10  ;;  %v155_v14 = vand.u32 4294901760, %v154_v11  ;;  %10456 = vmatprep.mubr.msk.f32.mxu1 %vm11589_vm2, %v11588_v21  ;;  %s11592_s16 = smov 112   ;;  %s11593_s17 = smov 120   ;;  %vm7933_vm6 = vcmask 261120   ;;  %vm9079_vm7 = vcmask 1040384  }
   0x8   :  { %v134_v12 = vand.u32 4294901760, %v133_v9  ;;  %s11594_s18 = smov 104   ;;  %s11595_s2 = smov 80   ;;  %vm9580_vm8 = vcmask 58368   ;;  %vm10077_vm9 = vcmask 9216  }
   0x9   :  { %v145_v16 = vsub.f32 %v143_v10, %v144_v13  ;;  %v156_v17 = vsub.f32 %v154_v11, %v155_v14  ;;  %s11596_s19 = smov 72   ;;  %s11597_s20 = smov 64  }
   0xa   :  { %v135_v15 = vsub.f32 %v133_v9, %v134_v12  ;;  %s11598_s21 = smov 56   ;;  %s11599_s22 = smov 48  }
   0xb   :  { %v146_v19 = vand.u32 4294901760, %v145_v16  ;;  %v157_v20 = vand.u32 4294901760, %v156_v17  ;;  %s11600_s23 = smov 40   ;;  %s11601_s24 = smov 8  }
   0xc   :  { %v136_v18 = vand.u32 4294901760, %v135_v15  ;;  %s11602_s25 = smov 16   ;;  %s11603_s26 = smov 24  }
   0xd   :  { %10429 = vmatprep.subr.mxu0 %v157_v20 }
   0xe   :  { %10426 = vmatprep.mubr.f32.mxu0 %v136_v18 }
   0xf   :  { %10427 = vmatmul.mubr.f32.vlgmr.msra.gmra.mrb[0].mxu0 %v146_v19 }
  0x10   :  { %10430 = vmatpush3.msra.mxu0 %v157_v20  ;;  %10431 = vmatprep.mubr.f32.mxu0 %v132_v7 }
  0x11   :  { %10434 = vmatprep.subr.mxu0 %v154_v11 }
  0x17   :  { %10432 = vmatmul.mubr.f32.vlgmr.msra.gmra.mrb[0].mxu0 %v142_v8 }
  0x18   :  { %10435 = vmatpush3.msra.mxu0 %v154_v11  ;;  %10436 = vmatprep.mubr.f32.mxu0 %v133_v9 }
  0x19   :  { %10439 = vmatprep.subr.mxu0 %v67_v6 }
  0x1f   :  { %10437 = vmatmul.mubr.f32.vlgmr.msra.gmra.mrb[0].mxu0 %v143_v10 }
  0x20   :  { %10440 = vmatpush3.msra.mxu0 %v67_v6  ;;  %10441 = vmatprep.mubr.f32.mxu0 %v134_v12 }
  0x21   :  { %10444 = vmatprep.subr.mxu0 %v155_v14 }
  0x27   :  { %10442 = vmatmul.mubr.f32.vlgmr.msra.gmra.mrb[0].mxu0 %v144_v13 }
  0x28   :  { %10445 = vmatpush3.msra.mxu0 %v155_v14  ;;  %10446 = vmatprep.mubr.f32.mxu0 %v132_v7 }
  0x29   :  { %10449 = vmatprep.subr.mxu0 %v67_v6 }
  0x2f   :  { %10447 = vmatmul.mubr.f32.vlgmr.msra.gmra.mrb[0].mxu0 %v142_v8 }
  0x30   :  { %10450 = vmatpush3.msra.mxu0 %v67_v6  ;;  %10451 = vmatprep.mubr.f32.mxu0 %v132_v7 }
  0x31   :  { %10484 = vmatprep.subr.mxu0 %v11588_v21 }
  0x37   :  { %10452 = vmatmul.mubr.f32.vlgmr.msra.gmra.mrb[0].mxu0 %v142_v8 }
  0x38   :  { %10486 = vmatprep.mubr.msk.f32.mxu0 %vm11589_vm2, %v11588_v21 }
 0x10a   :  { %v10453_v23 = vpop.f32.mrb[0].mxu0 }
 0x10b   :  { %v545_v24 = vpop.f32.mrb[1].mxu0  ;;  %v11703_v26 = vadd.f32 %v10453_v23, %v10093_v22 }
 0x10c   :  { %v11694_v25 = vadd.f32 %v10093_v22, %v545_v24 }
 0x10d   :  { %v4243_v19 = vsel %vm558_vm3, %v11703_v26, 0 }
 0x10e   :  { %1474 = vrot.lane.b32.xlu1 %v11694_v25, %s11590_s14  ;;  %556 = vrot.lane.b32.xlu0 %v11694_v25, %s11591_s15  ;;  %v559_v27 = vsel %vm558_vm3, %v11694_v25, 0  ;;  %v4313_v22 = vand.u32 4294901760, %v4243_v19 }
 0x10f   :  { %v629_v28 = vand.u32 4294901760, %v559_v27 }
 0x110   :  { %v4314_v24 = vsub.f32 %v4243_v19, %v4313_v22 }
 0x111   :  { %v630_v29 = vsub.f32 %v559_v27, %v629_v28 }
 0x112   :  { %2389 = vrot.lane.b32.xlu1 %v11694_v25, %s11592_s16  ;;  %1472 = vrot.lane.b32.xlu0 %v11694_v25, %s11593_s17 }
 0x113   :  { %v631_v30 = vand.u32 4294901760, %v630_v29 }
 0x115   :  { %v632_v33 = vsub.f32 %v630_v29, %v631_v30 }
 0x116   :  { %3306 = vrot.lane.b32.xlu1 %v11694_v25, %s11594_s18  ;;  %2391 = vrot.lane.b32.xlu0 %v11694_v25, %s11595_s2 }
 0x117   :  { %v633_v36 = vand.u32 4294901760, %v632_v33 }
 0x11a   :  { %4241 = vrot.lane.b32.xlu1 %v11703_v26, %s11591_s15  ;;  %3308 = vrot.lane.b32.xlu0 %v11694_v25, %s11596_s19 }
 0x11e   :  { %5158 = vrot.lane.b32.xlu1 %v11703_v26, %s11590_s14  ;;  %5156 = vrot.lane.b32.xlu0 %v11703_v26, %s11593_s17 }
 0x122   :  { %6075 = vrot.lane.b32.xlu1 %v11703_v26, %s11595_s2  ;;  %6073 = vrot.lane.b32.xlu0 %v11703_v26, %s11592_s16  ;;  %s11605_s16 = smov [#allocation2]  }
 0x126   :  { %6992 = vrot.lane.b32.xlu1 %v11703_v26, %s11596_s19  ;;  %6990 = vrot.lane.b32.xlu0 %v11703_v26, %s11594_s18  ;;  %s10085_s18 = sshll.u32 %s11605_s16, 4  ;;  %s10086_s18 = int_to_ptr.vmem [resolvable:$true] %s10085_s18 }
 0x127   :  { %s11564_s2 = scalar_lea.vmem %s10086_s18, 32  ;;  %p11569_p1 = scmp.lt.s32.totalorder %s10086_s18, %s10086_s18 }
 0x128   :  { %p11565_p0 = scmp.ne.s32.totalorder %s10086_s18, %s11564_s2  ;;  %p11570_p2 = scmp.lt.s32.totalorder %s11564_s2, %s11564_s2 }
 0x12a   :  { %p11571_p3 = por %p11570_p2, %p11569_p1 }
 0x12c   :  { %p11572_p4 = pnand %p11571_p3, %p11565_p0 }
 0x180   :  { %v557_v31 = vpop.permute.xlu0 %556  ;;  %v1475_v41 = vpop.permute.xlu1 %1474 }
 0x181   :  { %v561_v32 = vsel %vm558_vm3, %v557_v31, 0  ;;  %v1478_v43 = vsel %vm558_vm3, %v1475_v41, 0 }
 0x182   :  { %v564_v34 = vand.u32 4294901760, %v561_v32  ;;  %v1481_v45 = vand.u32 4294901760, %v1478_v43 }
 0x184   :  { %v641_v35 = vsub.f32 %v561_v32, %v564_v34  ;;  %10455 = vmatpush3.xpose.msra.mxu1 %v564_v34  ;;  %v1473_v40 = vpop.permute.xlu0 %1472  ;;  %v1558_v47 = vsub.f32 %v1478_v43, %v1481_v45  ;;  %v2390_v54 = vpop.permute.xlu1 %2389 }
 0x185   :  { %10459 = vmatprep.subr.mxu1 %v11588_v21  ;;  %v1476_v42 = vsel %vm558_vm3, %v1473_v40, 0  ;;  %v2393_v56 = vsel %vm558_vm3, %v2390_v54, 0 }
 0x186   :  { %v642_v37 = vand.u32 4294901760, %v641_v35  ;;  %v1546_v44 = vand.u32 4294901760, %v1476_v42  ;;  %v1559_v49 = vand.u32 4294901760, %v1558_v47  ;;  %v2463_v58 = vand.u32 4294901760, %v2393_v56 }
 0x187   :  { %10457 = vmatmul.mubr.f32.vlgmr.msra.gmra.mrb[0].mxu1 %v633_v36 }
 0x188   :  { %v643_v38 = vsub.f32 %v641_v35, %v642_v37  ;;  %10461 = vmatprep.mubr.msk.f32.mxu1 %vm11589_vm2, %v11588_v21  ;;  %v1547_v46 = vsub.f32 %v1476_v42, %v1546_v44  ;;  %v1560_v51 = vsub.f32 %v1558_v47, %v1559_v49  ;;  %v2392_v55 = vpop.permute.xlu0 %2391  ;;  %v2464_v60 = vsub.f32 %v2393_v56, %v2463_v58  ;;  %v3307_v4 = vpop.permute.xlu1 %3306 }
 0x189   :  { %v2395_v57 = vsel %vm558_vm3, %v2392_v55, 0  ;;  %v3310_v6 = vsel %vm558_vm3, %v3307_v4, 0 }
 0x18a   :  { %v644_v39 = vand.u32 4294901760, %v643_v38  ;;  %v1548_v48 = vand.u32 4294901760, %v1547_v46  ;;  %v1561_v53 = vand.u32 4294901760, %v1560_v51  ;;  %v2398_v59 = vand.u32 4294901760, %v2395_v57 }
 0x18b   :  { %v2465_v62 = vand.u32 4294901760, %v2464_v60  ;;  %v3380_v8 = vand.u32 4294901760, %v3310_v6 }
 0x18c   :  { %10460 = vmatpush3.xpose.msra.mxu1 %v644_v39  ;;  %v1549_v50 = vsub.f32 %v1547_v46, %v1548_v48  ;;  %v2475_v61 = vsub.f32 %v2395_v57, %v2398_v59  ;;  %v3309_v5 = vpop.permute.xlu0 %3308  ;;  %v4242_v18 = vpop.permute.xlu1 %4241 }
 0x18d   :  { %10464 = vmatprep.subr.mxu1 %v11588_v21  ;;  %v2466_v0 = vsub.f32 %v2464_v60, %v2465_v62  ;;  %v3312_v7 = vsel %vm558_vm3, %v3309_v5, 0  ;;  %v3381_v10 = vsub.f32 %v3310_v6, %v3380_v8  ;;  %v4245_v20 = vsel %vm558_vm3, %v4242_v18, 0 }
 0x18e   :  { %v1550_v52 = vand.u32 4294901760, %v1549_v50  ;;  %v2476_v63 = vand.u32 4294901760, %v2475_v61  ;;  %v3315_v9 = vand.u32 4294901760, %v3312_v7  ;;  %v4248_v23 = vand.u32 4294901760, %v4245_v20 }
 0x18f   :  { %10462 = vmatmul.mubr.f32.vlgmr.msra.gmra.mrb[0].mxu1 %v629_v28  ;;  %v2467_v2 = vand.u32 4294901760, %v2466_v0  ;;  %v3382_v12 = vand.u32 4294901760, %v3381_v10 }
 0x190   :  { %10465 = vmatpush3.xpose.msra.mxu1 %v641_v35  ;;  %10466 = vmatprep.mubr.msk.f32.mxu1 %vm11589_vm2, %v11588_v21  ;;  %v2477_v1 = vsub.f32 %v2475_v61, %v2476_v63  ;;  %v3392_v11 = vsub.f32 %v3312_v7, %v3315_v9  ;;  %v4325_v27 = vsub.f32 %v4245_v20, %v4248_v23  ;;  %v5159_v35 = vpop.permute.xlu1 %5158 }
 0x191   :  { %10469 = vmatprep.subr.mxu1 %v11588_v21  ;;  %v3383_v14 = vsub.f32 %v3381_v10, %v3382_v12 }
 0x192   :  { %v2478_v3 = vand.u32 4294901760, %v2477_v1  ;;  %v3393_v13 = vand.u32 4294901760, %v3392_v11 }
 0x193   :  { %v3384_v16 = vand.u32 4294901760, %v3383_v14 }
 0x194   :  { %v3394_v15 = vsub.f32 %v3392_v11, %v3393_v13 }
 0x196   :  { %v3395_v17 = vand.u32 4294901760, %v3394_v15 }
 0x197   :  { %10467 = vmatmul.mubr.f32.vlgmr.msra.gmra.mrb[0].mxu1 %v630_v29  ;;  %v4326_v29 = vand.u32 4294901760, %v4325_v27 }
 0x198   :  { %10470 = vmatpush3.xpose.msra.mxu1 %v564_v34  ;;  %10471 = vmatprep.mubr.msk.f32.mxu1 %vm11589_vm2, %v11588_v21 }
 0x199   :  { %10474 = vmatprep.subr.mxu1 %v11588_v21  ;;  %v4327_v31 = vsub.f32 %v4325_v27, %v4326_v29 }
 0x19b   :  { %v4328_v33 = vand.u32 4294901760, %v4327_v31 }
 0x19f   :  { %10472 = vmatmul.mubr.f32.vlgmr.msra.gmra.mrb[0].mxu1 %v631_v30 }
 0x1a0   :  { %10475 = vmatpush3.xpose.msra.mxu1 %v642_v37  ;;  %10476 = vmatprep.mubr.msk.f32.mxu1 %vm11589_vm2, %v11588_v21  ;;  %v5162_v37 = vsel %vm558_vm3, %v5159_v35, 0 }
 0x1a1   :  { %10479 = vmatprep.subr.mxu1 %v11588_v21  ;;  %v5165_v39 = vand.u32 4294901760, %v5162_v37 }
 0x1a3   :  { %v5242_v41 = vsub.f32 %v5162_v37, %v5165_v39 }
 0x1a5   :  { %v5243_v43 = vand.u32 4294901760, %v5242_v41 }
 0x1a7   :  { %10477 = vmatmul.mubr.f32.vlgmr.msra.gmra.mrb[0].mxu1 %v629_v28 }
 0x1a8   :  { %10480 = vmatpush3.xpose.msra.mxu1 %v564_v34  ;;  %10481 = vmatprep.mubr.msk.f32.mxu1 %vm11589_vm2, %v11588_v21  ;;  %v5157_v34 = vpop.permute.xlu0 %5156 }
 0x1a9   :  { %10514 = vmatprep.subr.mxu1 %v11588_v21  ;;  %v5160_v36 = vsel %vm558_vm3, %v5157_v34, 0 }
 0x1aa   :  { %v5230_v38 = vand.u32 4294901760, %v5160_v36 }
 0x1ac   :  { %v5231_v40 = vsub.f32 %v5160_v36, %v5230_v38 }
 0x1ae   :  { %v5232_v42 = vand.u32 4294901760, %v5231_v40 }
 0x1af   :  { %10482 = vmatmul.mubr.f32.vlgmr.msra.gmra.mrb[0].mxu1 %v629_v28  ;;  %v4315_v28 = vand.u32 4294901760, %v4314_v24 }
 0x1b0   :  { %10515 = vmatpush3.xpose.msra.mxu1 %v1481_v45  ;;  %10516 = vmatprep.mubr.msk.f32.mxu1 %vm11589_vm2, %v11588_v21 }
 0x1b1   :  { %10519 = vmatprep.subr.mxu1 %v11588_v21  ;;  %v4316_v30 = vsub.f32 %v4314_v24, %v4315_v28 }
 0x1b3   :  { %10517 = vmatmul.mubr.f32.vlgmr.msra.gmra.mrb[2].mxu1 %v1550_v52  ;;  %v4317_v32 = vand.u32 4294901760, %v4316_v30 }
 0x1b4   :  { %10520 = vmatpush3.xpose.msra.mxu1 %v1561_v53  ;;  %10521 = vmatprep.mubr.msk.f32.mxu1 %vm11589_vm2, %v11588_v21 }
 0x1b5   :  { %10524 = vmatprep.subr.mxu1 %v11588_v21 }
 0x1bb   :  { %10522 = vmatmul.mubr.f32.vlgmr.msra.gmra.mrb[2].mxu1 %v1546_v44 }
 0x1bc   :  { %10525 = vmatpush3.xpose.msra.mxu1 %v1558_v47  ;;  %10526 = vmatprep.mubr.msk.f32.mxu1 %vm11589_vm2, %v11588_v21 }
 0x1bd   :  { %10529 = vmatprep.subr.mxu1 %v11588_v21 }
 0x1c3   :  { %10527 = vmatmul.mubr.f32.vlgmr.msra.gmra.mrb[2].mxu1 %v1547_v46 }
 0x1c4   :  { %10530 = vmatpush3.xpose.msra.mxu1 %v1481_v45  ;;  %10531 = vmatprep.mubr.msk.f32.mxu1 %vm11589_vm2, %v11588_v21 }
 0x1c5   :  { %10534 = vmatprep.subr.mxu1 %v11588_v21 }
 0x1cb   :  { %10532 = vmatmul.mubr.f32.vlgmr.msra.gmra.mrb[2].mxu1 %v1548_v48  ;;  %v6074_v48 = vpop.permute.xlu0 %6073 }
 0x1cc   :  { %10535 = vmatpush3.xpose.msra.mxu1 %v1559_v49  ;;  %10536 = vmatprep.mubr.msk.f32.mxu1 %vm11589_vm2, %v11588_v21  ;;  %v6076_v49 = vpop.permute.xlu1 %6075  ;;  %v6077_v50 = vsel %vm558_vm3, %v6074_v48, 0 }
 0x1cd   :  { %10539 = vmatprep.subr.mxu1 %v11588_v21  ;;  %v6079_v51 = vsel %vm558_vm3, %v6076_v49, 0  ;;  %v6147_v52 = vand.u32 4294901760, %v6077_v50 }
 0x1ce   :  { %v6082_v53 = vand.u32 4294901760, %v6079_v51 }
 0x1cf   :  { %v6148_v54 = vsub.f32 %v6077_v50, %v6147_v52  ;;  %v6991_v1 = vpop.permute.xlu0 %6990 }
 0x1d0   :  { %v6159_v55 = vsub.f32 %v6079_v51, %v6082_v53 }
 0x1d3   :  { %10537 = vmatmul.mubr.f32.vlgmr.msra.gmra.mrb[2].mxu1 %v1546_v44 }
 0x1d4   :  { %10540 = vmatpush3.xpose.msra.mxu1 %v1481_v45  ;;  %10541 = vmatprep.mubr.msk.f32.mxu1 %vm11589_vm2, %v11588_v21  ;;  %v5244_v45 = vsub.f32 %v5242_v41, %v5243_v43 }
 0x1d5   :  { %10574 = vmatprep.subr.mxu1 %v11588_v21 }
 0x1d6   :  { %v5245_v47 = vand.u32 4294901760, %v5244_v45 }
 0x1db   :  { %10542 = vmatmul.mubr.f32.vlgmr.msra.gmra.mrb[2].mxu1 %v1546_v44  ;;  %v5233_v44 = vsub.f32 %v5231_v40, %v5232_v42 }
 0x1dc   :  { %10575 = vmatpush3.xpose.msra.mxu1 %v2398_v59  ;;  %10576 = vmatprep.mubr.msk.f32.mxu1 %vm11589_vm2, %v11588_v21 }
 0x1dd   :  { %10579 = vmatprep.subr.mxu1 %v11588_v21  ;;  %v5234_v46 = vand.u32 4294901760, %v5233_v44 }
 0x1df   :  { %10577 = vmatmul.mubr.f32.vlgmr.msra.gmra.mrb[4].mxu1 %v2467_v2  ;;  %v6993_v2 = vpop.permute.xlu1 %6992 }
 0x1e0   :  { %10580 = vmatpush3.xpose.msra.mxu1 %v2478_v3  ;;  %10581 = vmatprep.mubr.msk.f32.mxu1 %vm11589_vm2, %v11588_v21  ;;  %v6994_v3 = vsel %vm558_vm3, %v6991_v1, 0  ;;  %v6996_v4 = vsel %vm558_vm3, %v6993_v2, 0 }
 0x1e1   :  { %10584 = vmatprep.subr.mxu1 %v11588_v21  ;;  %v7064_v5 = vand.u32 4294901760, %v6994_v3  ;;  %v6999_v6 = vand.u32 4294901760, %v6996_v4 }
 0x1e3   :  { %v7065_v7 = vsub.f32 %v6994_v3, %v7064_v5 }
 0x1e7   :  { %10582 = vmatmul.mubr.f32.vlgmr.msra.gmra.mrb[4].mxu1 %v2463_v58 }
 0x1e8   :  { %10585 = vmatpush3.xpose.msra.mxu1 %v2475_v61  ;;  %10586 = vmatprep.mubr.msk.f32.mxu1 %vm11589_vm2, %v11588_v21 }
 0x1e9   :  { %10589 = vmatprep.subr.mxu1 %v11588_v21 }
 0x1ef   :  { %10587 = vmatmul.mubr.f32.vlgmr.msra.gmra.mrb[4].mxu1 %v2464_v60  ;;  %v6160_v60 = vand.u32 4294901760, %v6159_v55 }
 0x1f0   :  { %10590 = vmatpush3.xpose.msra.mxu1 %v2398_v59  ;;  %10591 = vmatprep.mubr.msk.f32.mxu1 %vm11589_vm2, %v11588_v21 }
 0x1f1   :  { %10594 = vmatprep.subr.mxu1 %v11588_v21 }
 0x1f7   :  { %10592 = vmatmul.mubr.f32.vlgmr.msra.gmra.mrb[4].mxu1 %v2465_v62  ;;  %v6161_v62 = vsub.f32 %v6159_v55, %v6160_v60 }
 0x1f8   :  { %10595 = vmatpush3.xpose.msra.mxu1 %v2476_v63  ;;  %10596 = vmatprep.mubr.msk.f32.mxu1 %vm11589_vm2, %v11588_v21 }
 0x1f9   :  { %10599 = vmatprep.subr.mxu1 %v11588_v21  ;;  %v6162_v0 = vand.u32 4294901760, %v6161_v62 }
 0x1ff   :  { %10597 = vmatmul.mubr.f32.vlgmr.msra.gmra.mrb[4].mxu1 %v2463_v58 }
 0x200   :  { %10600 = vmatpush3.xpose.msra.mxu1 %v2398_v59  ;;  %10601 = vmatprep.mubr.msk.f32.mxu1 %vm11589_vm2, %v11588_v21  ;;  %v6149_v59 = vand.u32 4294901760, %v6148_v54 }
 0x201   :  { %10634 = vmatprep.subr.mxu1 %v11588_v21 }
 0x202   :  { %v6150_v61 = vsub.f32 %v6148_v54, %v6149_v59 }
 0x204   :  { %v6151_v63 = vand.u32 4294901760, %v6150_v61 }
 0x207   :  { %10602 = vmatmul.mubr.f32.vlgmr.msra.gmra.mrb[4].mxu1 %v2463_v58 }
 0x208   :  { %10635 = vmatpush3.xpose.msra.mxu1 %v3315_v9  ;;  %10636 = vmatprep.mubr.msk.f32.mxu1 %vm11589_vm2, %v11588_v21 }
 0x209   :  { %10639 = vmatprep.subr.mxu1 %v11588_v21 }
 0x20b   :  { %10637 = vmatmul.mubr.f32.vlgmr.msra.gmra.mrb[6].mxu1 %v3384_v16 }
 0x20c   :  { %10640 = vmatpush3.xpose.msra.mxu1 %v3395_v17  ;;  %10641 = vmatprep.mubr.msk.f32.mxu1 %vm11589_vm2, %v11588_v21 }
 0x20d   :  { %10644 = vmatprep.subr.mxu1 %v11588_v21 }
 0x213   :  { %10642 = vmatmul.mubr.f32.vlgmr.msra.gmra.mrb[6].mxu1 %v3380_v8 }
 0x214   :  { %10645 = vmatpush3.xpose.msra.mxu1 %v3392_v11  ;;  %10646 = vmatprep.mubr.msk.f32.mxu1 %vm11589_vm2, %v11588_v21 }
 0x215   :  { %10649 = vmatprep.subr.mxu1 %v11588_v21 }
 0x21b   :  { %10647 = vmatmul.mubr.f32.vlgmr.msra.gmra.mrb[6].mxu1 %v3381_v10 }
 0x21c   :  { %10650 = vmatpush3.xpose.msra.mxu1 %v3315_v9  ;;  %10651 = vmatprep.mubr.msk.f32.mxu1 %vm11589_vm2, %v11588_v21 }
 0x21d   :  { %10654 = vmatprep.subr.mxu1 %v11588_v21 }
 0x223   :  { %10652 = vmatmul.mubr.f32.vlgmr.msra.gmra.mrb[6].mxu1 %v3382_v12  ;;  %v7066_v12 = vand.u32 4294901760, %v7065_v7 }
 0x224   :  { %10655 = vmatpush3.xpose.msra.mxu1 %v3393_v13  ;;  %10656 = vmatprep.mubr.msk.f32.mxu1 %vm11589_vm2, %v11588_v21 }
 0x225   :  { %10659 = vmatprep.subr.mxu1 %v11588_v21  ;;  %v7067_v14 = vsub.f32 %v7065_v7, %v7066_v12 }
 0x227   :  { %v7068_v16 = vand.u32 4294901760, %v7067_v14 }
 0x22b   :  { %10657 = vmatmul.mubr.f32.vlgmr.msra.gmra.mrb[6].mxu1 %v3380_v8 }
 0x22c   :  { %10660 = vmatpush3.xpose.msra.mxu1 %v3315_v9  ;;  %10661 = vmatprep.mubr.msk.f32.mxu1 %vm11589_vm2, %v11588_v21 }
 0x22d   :  { %10694 = vmatprep.subr.mxu1 %v11588_v21 }
 0x233   :  { %10662 = vmatmul.mubr.f32.vlgmr.msra.gmra.mrb[6].mxu1 %v3380_v8  ;;  %v7076_v8 = vsub.f32 %v6996_v4, %v6999_v6 }
 0x234   :  { %10695 = vmatpush3.xpose.msra.mxu1 %v4248_v23  ;;  %10696 = vmatprep.mubr.msk.f32.mxu1 %vm11589_vm2, %v11588_v21 }
 0x235   :  { %10699 = vmatprep.subr.mxu1 %v11588_v21  ;;  %v7077_v13 = vand.u32 4294901760, %v7076_v8 }
 0x237   :  { %10697 = vmatmul.mubr.f32.vlgmr.msra.gmra.mrb[8].mxu1 %v4317_v32  ;;  %v7078_v15 = vsub.f32 %v7076_v8, %v7077_v13 }
 0x238   :  { %10700 = vmatpush3.xpose.msra.mxu1 %v4328_v33  ;;  %10701 = vmatprep.mubr.msk.f32.mxu1 %vm11589_vm2, %v11588_v21 }
 0x239   :  { %10704 = vmatprep.subr.mxu1 %v11588_v21  ;;  %v7079_v17 = vand.u32 4294901760, %v7078_v15 }
 0x23f   :  { %10702 = vmatmul.mubr.f32.vlgmr.msra.gmra.mrb[8].mxu1 %v4313_v22 }
 0x240   :  { %10705 = vmatpush3.xpose.msra.mxu1 %v4325_v27  ;;  %10706 = vmatprep.mubr.msk.f32.mxu1 %vm11589_vm2, %v11588_v21 }
 0x241   :  { %10709 = vmatprep.subr.mxu1 %v11588_v21 }
 0x247   :  { %10707 = vmatmul.mubr.f32.vlgmr.msra.gmra.mrb[8].mxu1 %v4314_v24 }
 0x248   :  { %10710 = vmatpush3.xpose.msra.mxu1 %v4248_v23  ;;  %10711 = vmatprep.mubr.msk.f32.mxu1 %vm11589_vm2, %v11588_v21 }
 0x249   :  { %10714 = vmatprep.subr.mxu1 %v11588_v21 }
 0x24f   :  { %10712 = vmatmul.mubr.f32.vlgmr.msra.gmra.mrb[8].mxu1 %v4315_v28 }
 0x250   :  { %10715 = vmatpush3.xpose.msra.mxu1 %v4326_v29  ;;  %10716 = vmatprep.mubr.msk.f32.mxu1 %vm11589_vm2, %v11588_v21 }
 0x251   :  { %10719 = vmatprep.subr.mxu1 %v11588_v21 }
 0x257   :  { %10717 = vmatmul.mubr.f32.vlgmr.msra.gmra.mrb[8].mxu1 %v4313_v22 }
 0x258   :  { %10720 = vmatpush3.xpose.msra.mxu1 %v4248_v23  ;;  %10721 = vmatprep.mubr.msk.f32.mxu1 %vm11589_vm2, %v11588_v21 }
 0x259   :  { %10754 = vmatprep.subr.mxu1 %v11588_v21 }
 0x25f   :  { %10722 = vmatmul.mubr.f32.vlgmr.msra.gmra.mrb[8].mxu1 %v4313_v22 }
 0x260   :  { %10755 = vmatpush3.xpose.msra.mxu1 %v5165_v39  ;;  %10756 = vmatprep.mubr.msk.f32.mxu1 %vm11589_vm2, %v11588_v21 }
 0x261   :  { %10759 = vmatprep.subr.mxu1 %v11588_v21 }
 0x263   :  { %10757 = vmatmul.mubr.f32.vlgmr.msra.gmra.mrb[10].mxu1 %v5234_v46 }
 0x264   :  { %10760 = vmatpush3.xpose.msra.mxu1 %v5245_v47  ;;  %10761 = vmatprep.mubr.msk.f32.mxu1 %vm11589_vm2, %v11588_v21 }
 0x265   :  { %10764 = vmatprep.subr.mxu1 %v11588_v21 }
 0x26b   :  { %10762 = vmatmul.mubr.f32.vlgmr.msra.gmra.mrb[10].mxu1 %v5230_v38 }
 0x26c   :  { %10765 = vmatpush3.xpose.msra.mxu1 %v5242_v41  ;;  %10766 = vmatprep.mubr.msk.f32.mxu1 %vm11589_vm2, %v11588_v21 }
 0x26d   :  { %10769 = vmatprep.subr.mxu1 %v11588_v21 }
 0x273   :  { %10767 = vmatmul.mubr.f32.vlgmr.msra.gmra.mrb[10].mxu1 %v5231_v40 }
 0x274   :  { %10770 = vmatpush3.xpose.msra.mxu1 %v5165_v39  ;;  %10771 = vmatprep.mubr.msk.f32.mxu1 %vm11589_vm2, %v11588_v21 }
 0x275   :  { %10774 = vmatprep.subr.mxu1 %v11588_v21 }
 0x27b   :  { %10772 = vmatmul.mubr.f32.vlgmr.msra.gmra.mrb[10].mxu1 %v5232_v42 }
 0x27c   :  { %10775 = vmatpush3.xpose.msra.mxu1 %v5243_v43  ;;  %10776 = vmatprep.mubr.msk.f32.mxu1 %vm11589_vm2, %v11588_v21 }
 0x27d   :  { %10779 = vmatprep.subr.mxu1 %v11588_v21 }
 0x282   :  { %v11833_v56 = vpop.f32.mrb[0].mxu1 }
 0x283   :  { %v10483_v57 = vpop.f32.mrb[1].mxu1  ;;  %10777 = vmatmul.mubr.f32.vlgmr.msra.gmra.mrb[10].mxu1 %v5230_v38  ;;  %v1009_v58 = vsel %vm558_vm3, %v11833_v56, -inf }
 0x284   :  { %10780 = vmatpush3.xpose.msra.mxu1 %v5165_v39  ;;  %1010 = vmax.xlane.f32.xlu0 %v1009_v58 }
 0x285   :  { %10781 = vmatprep.mubr.msk.f32.mxu1 %vm11589_vm2, %v11588_v21  ;;  %10814 = vmatprep.subr.mxu1 %v11588_v21 }
 0x28b   :  { %10782 = vmatmul.mubr.f32.vlgmr.msra.gmra.mrb[10].mxu1 %v5230_v38 }
 0x28c   :  { %10815 = vmatpush3.xpose.msra.mxu1 %v6082_v53  ;;  %10816 = vmatprep.mubr.msk.f32.mxu1 %vm11589_vm2, %v11588_v21 }
 0x28d   :  { %10819 = vmatprep.subr.mxu1 %v11588_v21 }
 0x28f   :  { %10817 = vmatmul.mubr.f32.vlgmr.msra.gmra.mrb[12].mxu1 %v6151_v63 }
 0x290   :  { %10820 = vmatpush3.xpose.msra.mxu1 %v6162_v0  ;;  %10821 = vmatprep.mubr.msk.f32.mxu1 %vm11589_vm2, %v11588_v21 }
 0x291   :  { %10824 = vmatprep.subr.mxu1 %v11588_v21 }
 0x297   :  { %10822 = vmatmul.mubr.f32.vlgmr.msra.gmra.mrb[12].mxu1 %v6147_v52 }
 0x298   :  { %10825 = vmatpush3.xpose.msra.mxu1 %v6159_v55  ;;  %10826 = vmatprep.mubr.msk.f32.mxu1 %vm11589_vm2, %v11588_v21 }
 0x299   :  { %10829 = vmatprep.subr.mxu1 %v11588_v21 }
 0x29f   :  { %10827 = vmatmul.mubr.f32.vlgmr.msra.gmra.mrb[12].mxu1 %v6148_v54 }
 0x2a0   :  { %10830 = vmatpush3.xpose.msra.mxu1 %v6082_v53  ;;  %10831 = vmatprep.mubr.msk.f32.mxu1 %vm11589_vm2, %v11588_v21 }
 0x2a1   :  { %10834 = vmatprep.subr.mxu1 %v11588_v21 }
 0x2a7   :  { %10832 = vmatmul.mubr.f32.vlgmr.msra.gmra.mrb[12].mxu1 %v6149_v59 }
 0x2a8   :  { %10835 = vmatpush3.xpose.msra.mxu1 %v6160_v60  ;;  %10836 = vmatprep.mubr.msk.f32.mxu1 %vm11589_vm2, %v11588_v21 }
 0x2a9   :  { %10839 = vmatprep.subr.mxu1 %v11588_v21 }
 0x2ae   :  { %v1922_v9 = vpop.f32.mrb[2].mxu1 }
 0x2af   :  { %v10543_v10 = vpop.f32.mrb[3].mxu1  ;;  %10837 = vmatmul.mubr.f32.vlgmr.msra.gmra.mrb[12].mxu1 %v6147_v52  ;;  %v1926_v11 = vsel %vm558_vm3, %v1922_v9, -inf }
 0x2b0   :  { %10840 = vmatpush3.xpose.msra.mxu1 %v6082_v53  ;;  %1927 = vmax.xlane.f32.xlu1 %v1926_v11 }
 0x2b1   :  { %10841 = vmatprep.mubr.msk.f32.mxu1 %vm11589_vm2, %v11588_v21  ;;  %10874 = vmatprep.subr.mxu1 %v11588_v21 }
 0x2b7   :  { %10842 = vmatmul.mubr.f32.vlgmr.msra.gmra.mrb[12].mxu1 %v6147_v52 }
 0x2b8   :  { %10875 = vmatpush3.xpose.msra.mxu1 %v6999_v6  ;;  %10876 = vmatprep.mubr.msk.f32.mxu1 %vm11589_vm2, %v11588_v21 }
 0x2b9   :  { %10879 = vmatprep.subr.mxu1 %v11588_v21 }
 0x2bb   :  { %10877 = vmatmul.mubr.f32.vlgmr.msra.gmra.mrb[14].mxu1 %v7068_v16 }
 0x2bc   :  { %10880 = vmatpush3.xpose.msra.mxu1 %v7079_v17  ;;  %10881 = vmatprep.mubr.msk.f32.mxu1 %vm11589_vm2, %v11588_v21 }
 0x2bd   :  { %10884 = vmatprep.subr.mxu1 %v11588_v21 }
 0x2c1   :  { %1020 = vrot.lane.b32.xlu1 %v11694_v25, %s11597_s20 }
 0x2c3   :  { %10882 = vmatmul.mubr.f32.vlgmr.msra.gmra.mrb[14].mxu1 %v7064_v5 }
 0x2c4   :  { %10885 = vmatpush3.xpose.msra.mxu1 %v7076_v8  ;;  %10886 = vmatprep.mubr.msk.f32.mxu1 %vm11589_vm2, %v11588_v21 }
 0x2c5   :  { %10889 = vmatprep.subr.mxu1 %v11588_v21 }
 0x2cb   :  { %10887 = vmatmul.mubr.f32.vlgmr.msra.gmra.mrb[14].mxu1 %v7065_v7 }
 0x2cc   :  { %10890 = vmatpush3.xpose.msra.mxu1 %v6999_v6  ;;  %10891 = vmatprep.mubr.msk.f32.mxu1 %vm11589_vm2, %v11588_v21 }
 0x2cd   :  { %10894 = vmatprep.subr.mxu1 %v11588_v21 }
 0x2d3   :  { %10892 = vmatmul.mubr.f32.vlgmr.msra.gmra.mrb[14].mxu1 %v7066_v12 }
 0x2d4   :  { %10895 = vmatpush3.xpose.msra.mxu1 %v7077_v13  ;;  %10896 = vmatprep.mubr.msk.f32.mxu1 %vm11589_vm2, %v11588_v21 }
 0x2d5   :  { %10899 = vmatprep.subr.mxu1 %v11588_v21 }
 0x2da   :  { %v2839_v18 = vpop.f32.mrb[4].mxu1 }
 0x2db   :  { %v10603_v19 = vpop.f32.mrb[5].mxu1  ;;  %10897 = vmatmul.mubr.f32.vlgmr.msra.gmra.mrb[14].mxu1 %v7064_v5  ;;  %v2843_v30 = vsel %vm558_vm3, %v2839_v18, -inf }
 0x2dc   :  { %10900 = vmatpush3.xpose.msra.mxu1 %v6999_v6  ;;  %10901 = vmatprep.mubr.msk.f32.mxu1 %vm11589_vm2, %v11588_v21 }
 0x2e3   :  { %10902 = vmatmul.mubr.f32.vlgmr.msra.gmra.mrb[14].mxu1 %v7064_v5 }
 0x306   :  { %v3756_v20 = vpop.f32.mrb[6].mxu1 }
 0x307   :  { %v10663_v22 = vpop.f32.mrb[7].mxu1  ;;  %v3760_v31 = vsel %vm558_vm3, %v3756_v20, -inf }
 0x311   :  { %v1011_v23 = vpop.xlane.xlu0 %1010 }
 0x312   :  { %v1012_v24 = vsub.f32 %v11833_v56, %v1011_v23 }
 0x314   :  { %v1013_v27 = vmul.f32 1.442695, %v1012_v24 }
 0x316   :  { %11530 = vpow2.f32 %v1013_v27 }
 0x320   :  { %v11531_v28 = vpop.eup %11530 }
 0x321   :  { %v1015_v29 = vsel %vm558_vm3, %v11531_v28, 0.0 }
 0x322   :  { %1016 = vadd.xlane.f32.xlu0 %v1015_v29 }
 0x326   :  { %2844 = vmax.xlane.f32.xlu0 %v2843_v30 }
 0x32a   :  { %3761 = vmax.xlane.f32.xlu0 %v3760_v31 }
 0x332   :  { %v11884_v32 = vpop.f32.mrb[8].mxu1 }
 0x333   :  { %v10723_v33 = vpop.f32.mrb[9].mxu1  ;;  %v4693_v43 = vsel %vm558_vm3, %v11884_v32, -inf }
 0x33d   :  { %v1928_v34 = vpop.xlane.xlu1 %1927 }
 0x33e   :  { %v1929_v35 = vsub.f32 %v1922_v9, %v1928_v34 }
 0x340   :  { %v1930_v36 = vmul.f32 1.442695, %v1929_v35 }
 0x341   :  { %v1021_v37 = vpop.permute.xlu1 %1020 }
 0x342   :  { %11532 = vpow2.f32 %v1930_v36  ;;  %v11886_v38 = vand.u32 4294901760, %v1021_v37 }
 0x344   :  { %10485 = vmatpush3.msra.mxu0 %v11886_v38  ;;  %v1104_v56 = vsub.f32 %v1021_v37, %v11886_v38 }
 0x345   :  { %10489 = vmatprep.subr.mxu0 %v11588_v21 }
 0x346   :  { %v1105_v60 = vand.u32 4294901760, %v1104_v56 }
 0x348   :  { %v1106_v0 = vsub.f32 %v1104_v56, %v1105_v60 }
 0x34a   :  { %v1107_v5 = vand.u32 4294901760, %v1106_v0 }
 0x34c   :  { %v11890_v39 = vpop.eup %11532 }
 0x34d   :  { %v1932_v40 = vsel %vm558_vm3, %v11890_v39, 0.0 }
 0x34e   :  { %1933 = vadd.xlane.f32.xlu0 %v1932_v40 }
 0x35e   :  { %v11894_v41 = vpop.f32.mrb[10].mxu1 }
 0x35f   :  { %v10783_v42 = vpop.f32.mrb[11].mxu1  ;;  %v5610_v7 = vsel %vm558_vm3, %v11894_v41, -inf }
 0x364   :  { %1937 = vrot.lane.b32.xlu0 %v11694_v25, %s11598_s21 }
 0x383   :  { %4694 = vmax.xlane.f32.xlu0 %v4693_v43 }
 0x38a   :  { %v11900_v44 = vpop.f32.mrb[12].mxu1 }
 0x38b   :  { %v10843_v45 = vpop.f32.mrb[13].mxu1  ;;  %v6527_v23 = vsel %vm558_vm3, %v11900_v44, -inf }
 0x3af   :  { %v1017_v46 = vpop.xlane.xlu0 %1016 }
 0x3b0   :  { %11534 = vrcp.f32 %v1017_v46 }
 0x3b3   :  { %v2845_v47 = vpop.xlane.xlu0 %2844 }
 0x3b4   :  { %v2846_v48 = vsub.f32 %v2839_v18, %v2845_v47 }
 0x3b6   :  { %v2847_v49 = vmul.f32 1.442695, %v2846_v48  ;;  %v11902_v50 = vpop.f32.mrb[14].mxu1 }
 0x3b7   :  { %v3762_v51 = vpop.xlane.xlu0 %3761  ;;  %v10903_v52 = vpop.f32.mrb[15].mxu1  ;;  %v7444_v24 = vsel %vm558_vm3, %v11902_v50, -inf }
 0x3b8   :  { %11536 = vpow2.f32 %v2847_v49  ;;  %v3763_v53 = vsub.f32 %v3756_v20, %v3762_v51 }
 0x3ba   :  { %v11535_v54 = vpop.eup %11534  ;;  %v3764_v55 = vmul.f32 1.442695, %v3763_v53 }
 0x3bb   :  { %v1019_v57 = vmul.f32 %v11535_v54, %v11531_v28 }
 0x3bc   :  { %11538 = vpow2.f32 %v3764_v55 }
 0x3bd   :  { %v1024_v58 = vsel %vm558_vm3, %v1019_v57, 0 }
 0x3be   :  { %v1092_v59 = vand.u32 4294901760, %v1024_v58 }
 0x3c0   :  { %v1093_v61 = vsub.f32 %v1024_v58, %v1092_v59 }
 0x3c2   :  { %v11906_v62 = vpop.eup %11536  ;;  %v1094_v63 = vand.u32 4294901760, %v1093_v61 }
 0x3c3   :  { %v2849_v1 = vsel %vm558_vm3, %v11906_v62, 0.0 }
 0x3c4   :  { %2850 = vadd.xlane.f32.xlu1 %v2849_v1  ;;  %v1095_v2 = vsub.f32 %v1093_v61, %v1094_v63 }
 0x3c6   :  { %v11910_v3 = vpop.eup %11538  ;;  %v1096_v4 = vand.u32 4294901760, %v1095_v2 }
 0x3c7   :  { %v3766_v6 = vsel %vm558_vm3, %v11910_v3, 0.0 }
 0x3c8   :  { %10487 = vmatmul.mubr.f32.vlgmr.msra.gmra.mrb[2].mxu0 %v1096_v4  ;;  %3767 = vadd.xlane.f32.xlu0 %v3766_v6 }
 0x3c9   :  { %10490 = vmatpush3.msra.mxu0 %v1107_v5  ;;  %10491 = vmatprep.mubr.msk.f32.mxu0 %vm11589_vm2, %v11588_v21 }
 0x3ca   :  { %10494 = vmatprep.subr.mxu0 %v11588_v21 }
 0x3cc   :  { %5611 = vmax.xlane.f32.xlu0 %v5610_v7 }
 0x3d0   :  { %10492 = vmatmul.mubr.f32.vlgmr.msra.gmra.mrb[2].mxu0 %v1092_v59 }
 0x3d1   :  { %10495 = vmatpush3.msra.mxu0 %v1104_v56  ;;  %10496 = vmatprep.mubr.msk.f32.mxu0 %vm11589_vm2, %v11588_v21 }
 0x3d2   :  { %10499 = vmatprep.subr.mxu0 %v11588_v21 }
 0x3d5   :  { %2854 = vrot.lane.b32.xlu1 %v11694_v25, %s11599_s22 }
 0x3d8   :  { %10497 = vmatmul.mubr.f32.vlgmr.msra.gmra.mrb[2].mxu0 %v1093_v61 }
 0x3d9   :  { %10500 = vmatpush3.msra.mxu0 %v11886_v38  ;;  %3771 = vrot.lane.b32.xlu1 %v11694_v25, %s11600_s23 }
 0x3da   :  { %10501 = vmatprep.mubr.msk.f32.mxu0 %vm11589_vm2, %v11588_v21  ;;  %10504 = vmatprep.subr.mxu0 %v11588_v21 }
 0x3db   :  { %v1934_v8 = vpop.xlane.xlu0 %1933 }
 0x3dc   :  { %11540 = vrcp.f32 %v1934_v8 }
 0x3df   :  { %v1938_v9 = vpop.permute.xlu0 %1937 }
 0x3e0   :  { %10502 = vmatmul.mubr.f32.vlgmr.msra.gmra.mrb[2].mxu0 %v1094_v63  ;;  %v1944_v10 = vand.u32 4294901760, %v1938_v9 }
 0x3e1   :  { %10505 = vmatpush3.msra.mxu0 %v1105_v60  ;;  %10506 = vmatprep.mubr.msk.f32.mxu0 %vm11589_vm2, %v11588_v21 }
 0x3e2   :  { %10509 = vmatprep.subr.mxu0 %v11588_v21  ;;  %v2021_v25 = vsub.f32 %v1938_v9, %v1944_v10 }
 0x3e4   :  { %v2022_v15 = vand.u32 4294901760, %v2021_v25 }
 0x3e6   :  { %v11541_v11 = vpop.eup %11540  ;;  %v2023_v18 = vsub.f32 %v2021_v25, %v2022_v15 }
 0x3e7   :  { %v1936_v12 = vmul.f32 %v11541_v11, %v11890_v39 }
 0x3e8   :  { %10507 = vmatmul.mubr.f32.vlgmr.msra.gmra.mrb[2].mxu0 %v1092_v59  ;;  %v2024_v22 = vand.u32 4294901760, %v2023_v18 }
 0x3e9   :  { %10510 = vmatpush3.msra.mxu0 %v11886_v38  ;;  %10511 = vmatprep.mubr.msk.f32.mxu0 %vm11589_vm2, %v11588_v21  ;;  %v1941_v13 = vsel %vm558_vm3, %v1936_v12, 0 }
 0x3ea   :  { %10544 = vmatprep.subr.mxu0 %v11588_v21  ;;  %v2009_v14 = vand.u32 4294901760, %v1941_v13 }
 0x3ec   :  { %v2010_v16 = vsub.f32 %v1941_v13, %v2009_v14 }
 0x3ee   :  { %v2011_v17 = vand.u32 4294901760, %v2010_v16 }
 0x3f0   :  { %10512 = vmatmul.mubr.f32.vlgmr.msra.gmra.mrb[2].mxu0 %v1092_v59  ;;  %v2012_v19 = vsub.f32 %v2010_v16, %v2011_v17 }
 0x3f1   :  { %10545 = vmatpush3.msra.mxu0 %v1944_v10  ;;  %10546 = vmatprep.mubr.msk.f32.mxu0 %vm11589_vm2, %v11588_v21 }
 0x3f2   :  { %10549 = vmatprep.subr.mxu0 %v11588_v21  ;;  %v2013_v20 = vand.u32 4294901760, %v2012_v19 }
 0x3f4   :  { %10547 = vmatmul.mubr.f32.vlgmr.msra.gmra.mrb[4].mxu0 %v2013_v20 }
 0x3f5   :  { %10550 = vmatpush3.msra.mxu0 %v2024_v22  ;;  %10551 = vmatprep.mubr.msk.f32.mxu0 %vm11589_vm2, %v11588_v21 }
 0x3f6   :  { %10554 = vmatprep.subr.mxu0 %v11588_v21 }
 0x3fc   :  { %10552 = vmatmul.mubr.f32.vlgmr.msra.gmra.mrb[4].mxu0 %v2009_v14 }
 0x3fd   :  { %10555 = vmatpush3.msra.mxu0 %v2021_v25  ;;  %6528 = vmax.xlane.f32.xlu1 %v6527_v23 }
 0x3fe   :  { %10556 = vmatprep.mubr.msk.f32.mxu0 %vm11589_vm2, %v11588_v21  ;;  %10559 = vmatprep.subr.mxu0 %v11588_v21 }
 0x401   :  { %7445 = vmax.xlane.f32.xlu1 %v7444_v24 }
 0x404   :  { %10557 = vmatmul.mubr.f32.vlgmr.msra.gmra.mrb[4].mxu0 %v2010_v16 }
 0x405   :  { %10560 = vmatpush3.msra.mxu0 %v1944_v10  ;;  %10561 = vmatprep.mubr.msk.f32.mxu0 %vm11589_vm2, %v11588_v21 }
 0x406   :  { %10564 = vmatprep.subr.mxu0 %v11588_v21 }
 0x40c   :  { %10562 = vmatmul.mubr.f32.vlgmr.msra.gmra.mrb[4].mxu0 %v2011_v17 }
 0x40d   :  { %10565 = vmatpush3.msra.mxu0 %v2022_v15  ;;  %10566 = vmatprep.mubr.msk.f32.mxu0 %vm11589_vm2, %v11588_v21 }
 0x40e   :  { %10569 = vmatprep.subr.mxu0 %v11588_v21 }
 0x410   :  { %v4695_v27 = vpop.xlane.xlu0 %4694 }
 0x411   :  { %v4696_v28 = vsub.f32 %v11884_v32, %v4695_v27 }
 0x412   :  { %5621 = vrot.lane.b32.xlu1 %v11703_v26, %s11598_s21 }
 0x413   :  { %v4697_v29 = vmul.f32 1.442695, %v4696_v28 }
 0x414   :  { %10567 = vmatmul.mubr.f32.vlgmr.msra.gmra.mrb[4].mxu0 %v2009_v14 }
 0x415   :  { %11542 = vpow2.f32 %v4697_v29  ;;  %10570 = vmatpush3.msra.mxu0 %v1944_v10  ;;  %10571 = vmatprep.mubr.msk.f32.mxu0 %vm11589_vm2, %v11588_v21 }
 0x416   :  { %6538 = vrot.lane.b32.xlu1 %v11703_v26, %s11599_s22  ;;  %10604 = vmatprep.subr.mxu0 %v11588_v21 }
 0x41a   :  { %7455 = vrot.lane.b32.xlu1 %v11703_v26, %s11600_s23 }
 0x41c   :  { %10572 = vmatmul.mubr.f32.vlgmr.msra.gmra.mrb[4].mxu0 %v2009_v14 }
 0x41d   :  { %10606 = vmatprep.mubr.msk.f32.mxu0 %vm11589_vm2, %v11588_v21 }
 0x41f   :  { %v11970_v30 = vpop.eup %11542 }
 0x420   :  { %v4699_v31 = vsel %vm558_vm3, %v11970_v30, 0.0 }
 0x421   :  { %4700 = vadd.xlane.f32.xlu0 %v4699_v31 }
 0x437   :  { %4704 = vrot.lane.b32.xlu0 %v11703_v26, %s11597_s20 }
 0x451   :  { %v2851_v32 = vpop.xlane.xlu1 %2850 }
 0x452   :  { %11544 = vrcp.f32 %v2851_v32 }
 0x455   :  { %v2855_v33 = vpop.permute.xlu1 %2854  ;;  %v3768_v34 = vpop.xlane.xlu0 %3767 }
 0x456   :  { %v2861_v35 = vand.u32 4294901760, %v2855_v33 }
 0x458   :  { %10605 = vmatpush3.msra.mxu0 %v2861_v35  ;;  %v2938_v42 = vsub.f32 %v2855_v33, %v2861_v35 }
 0x459   :  { %v5612_v36 = vpop.xlane.xlu0 %5611  ;;  %10609 = vmatprep.subr.mxu0 %v11588_v21  ;;  %v3772_v57 = vpop.permute.xlu1 %3771 }
 0x45a   :  { %v5613_v37 = vsub.f32 %v11894_v41, %v5612_v36  ;;  %v2939_v45 = vand.u32 4294901760, %v2938_v42  ;;  %v3778_v59 = vand.u32 4294901760, %v3772_v57 }
 0x45c   :  { %v11545_v38 = vpop.eup %11544  ;;  %v5614_v39 = vmul.f32 1.442695, %v5613_v37  ;;  %v2940_v48 = vsub.f32 %v2938_v42, %v2939_v45  ;;  %v3855_v61 = vsub.f32 %v3772_v57, %v3778_v59 }
 0x45d   :  { %v2853_v40 = vmul.f32 %v11545_v38, %v11906_v62 }
 0x45e   :  { %11546 = vpow2.f32 %v5614_v39  ;;  %v2941_v53 = vand.u32 4294901760, %v2940_v48  ;;  %v3856_v1 = vand.u32 4294901760, %v3855_v61 }
 0x45f   :  { %v2858_v43 = vsel %vm558_vm3, %v2853_v40, 0  ;;  %11548 = vrcp.f32 %v3768_v34 }
 0x460   :  { %v2926_v26 = vand.u32 4294901760, %v2858_v43  ;;  %v3857_v6 = vsub.f32 %v3855_v61, %v3856_v1 }
 0x462   :  { %v2927_v46 = vsub.f32 %v2858_v43, %v2926_v26  ;;  %v3858_v8 = vand.u32 4294901760, %v3857_v6 }
 0x464   :  { %v2928_v47 = vand.u32 4294901760, %v2927_v46 }
 0x466   :  { %v2929_v49 = vsub.f32 %v2927_v46, %v2928_v47 }
 0x468   :  { %v11980_v51 = vpop.eup %11546  ;;  %v2930_v52 = vand.u32 4294901760, %v2929_v49 }
 0x469   :  { %v5616_v41 = vsel %vm558_vm3, %v11980_v51, 0.0  ;;  %v11549_v54 = vpop.eup %11548 }
 0x46a   :  { %10607 = vmatmul.mubr.f32.vlgmr.msra.gmra.mrb[6].mxu0 %v2930_v52  ;;  %5617 = vadd.xlane.f32.xlu0 %v5616_v41  ;;  %v3770_v55 = vmul.f32 %v11549_v54, %v11910_v3 }
 0x46b   :  { %10610 = vmatpush3.msra.mxu0 %v2941_v53  ;;  %10611 = vmatprep.mubr.msk.f32.mxu0 %vm11589_vm2, %v11588_v21 }
 0x46c   :  { %10614 = vmatprep.subr.mxu0 %v11588_v21  ;;  %v3775_v56 = vsel %vm558_vm3, %v3770_v55, 0 }
 0x46d   :  { %v3843_v58 = vand.u32 4294901760, %v3775_v56 }
 0x46f   :  { %v3844_v60 = vsub.f32 %v3775_v56, %v3843_v58 }
 0x471   :  { %v3845_v0 = vand.u32 4294901760, %v3844_v60 }
 0x472   :  { %10612 = vmatmul.mubr.f32.vlgmr.msra.gmra.mrb[6].mxu0 %v2926_v26 }
 0x473   :  { %10615 = vmatpush3.msra.mxu0 %v2938_v42  ;;  %10616 = vmatprep.mubr.msk.f32.mxu0 %vm11589_vm2, %v11588_v21  ;;  %v3846_v5 = vsub.f32 %v3844_v60, %v3845_v0 }
 0x474   :  { %10619 = vmatprep.subr.mxu0 %v11588_v21 }
 0x47a   :  { %10617 = vmatmul.mubr.f32.vlgmr.msra.gmra.mrb[6].mxu0 %v2927_v46 }
 0x47b   :  { %10620 = vmatpush3.msra.mxu0 %v2861_v35  ;;  %10621 = vmatprep.mubr.msk.f32.mxu0 %vm11589_vm2, %v11588_v21 }
 0x47c   :  { %10624 = vmatprep.subr.mxu0 %v11588_v21 }
 0x482   :  { %10622 = vmatmul.mubr.f32.vlgmr.msra.gmra.mrb[6].mxu0 %v2928_v47 }
 0x483   :  { %10625 = vmatpush3.msra.mxu0 %v2939_v45  ;;  %10626 = vmatprep.mubr.msk.f32.mxu0 %vm11589_vm2, %v11588_v21 }
 0x484   :  { %10629 = vmatprep.subr.mxu0 %v11588_v21 }
 0x48a   :  { %10627 = vmatmul.mubr.f32.vlgmr.msra.gmra.mrb[6].mxu0 %v2926_v26  ;;  %v6529_v62 = vpop.xlane.xlu1 %6528 }
 0x48b   :  { %10630 = vmatpush3.msra.mxu0 %v2861_v35  ;;  %v6530_v63 = vsub.f32 %v11900_v44, %v6529_v62  ;;  %10631 = vmatprep.mubr.msk.f32.mxu0 %vm11589_vm2, %v11588_v21  ;;  %v3847_v44 = vand.u32 4294901760, %v3846_v5 }
 0x48c   :  { %10664 = vmatprep.subr.mxu0 %v11588_v21 }
 0x48d   :  { %v6531_v2 = vmul.f32 1.442695, %v6530_v63 }
 0x48e   :  { %v7446_v3 = vpop.xlane.xlu1 %7445 }
 0x48f   :  { %11550 = vpow2.f32 %v6531_v2  ;;  %v7447_v4 = vsub.f32 %v11902_v50, %v7446_v3 }
 0x491   :  { %v7448_v7 = vmul.f32 1.442695, %v7447_v4 }
 0x492   :  { %10632 = vmatmul.mubr.f32.vlgmr.msra.gmra.mrb[6].mxu0 %v2926_v26  ;;  %v5622_v31 = vpop.permute.xlu1 %5621 }
 0x493   :  { %11552 = vpow2.f32 %v7448_v7  ;;  %10665 = vmatpush3.msra.mxu0 %v3778_v59  ;;  %10666 = vmatprep.mubr.msk.f32.mxu0 %vm11589_vm2, %v11588_v21  ;;  %v5628_v32 = vand.u32 4294901760, %v5622_v31 }
 0x494   :  { %10669 = vmatprep.subr.mxu0 %v11588_v21 }
 0x495   :  { %v5705_v37 = vsub.f32 %v5622_v31, %v5628_v32 }
 0x496   :  { %10667 = vmatmul.mubr.f32.vlgmr.msra.gmra.mrb[8].mxu0 %v3847_v44 }
 0x497   :  { %10670 = vmatpush3.msra.mxu0 %v3858_v8  ;;  %10671 = vmatprep.mubr.msk.f32.mxu0 %vm11589_vm2, %v11588_v21  ;;  %v5706_v42 = vand.u32 4294901760, %v5705_v37 }
 0x498   :  { %10674 = vmatprep.subr.mxu0 %v11588_v21 }
 0x499   :  { %v12009_v50 = vpop.eup %11550  ;;  %v5707_v45 = vsub.f32 %v5705_v37, %v5706_v42 }
 0x49a   :  { %v6533_v9 = vsel %vm558_vm3, %v12009_v50, 0.0 }
 0x49b   :  { %6534 = vadd.xlane.f32.xlu0 %v6533_v9  ;;  %v5708_v48 = vand.u32 4294901760, %v5707_v45  ;;  %v7924_v45 = vld [vmem:[%s12320_s3 + $0x10] sm:$0xff] }
 0x49d   :  { %v12013_v10 = vpop.eup %11552 }
 0x49e   :  { %10672 = vmatmul.mubr.f32.vlgmr.msra.gmra.mrb[8].mxu0 %v3843_v58  ;;  %v7450_v11 = vsel %vm558_vm3, %v12013_v10, 0.0 }
 0x49f   :  { %10675 = vmatpush3.msra.mxu0 %v3855_v61  ;;  %7451 = vadd.xlane.f32.xlu0 %v7450_v11 }
 0x4a0   :  { %10676 = vmatprep.mubr.msk.f32.mxu0 %vm11589_vm2, %v11588_v21  ;;  %10679 = vmatprep.subr.mxu0 %v11588_v21 }
 0x4a6   :  { %10677 = vmatmul.mubr.f32.vlgmr.msra.gmra.mrb[8].mxu0 %v3844_v60 }
 0x4a7   :  { %10680 = vmatpush3.msra.mxu0 %v3778_v59  ;;  %10681 = vmatprep.mubr.msk.f32.mxu0 %vm11589_vm2, %v11588_v21 }
 0x4a8   :  { %10684 = vmatprep.subr.mxu0 %v11588_v21 }
 0x4ae   :  { %10682 = vmatmul.mubr.f32.vlgmr.msra.gmra.mrb[8].mxu0 %v3845_v0  ;;  %v4701_v12 = vpop.xlane.xlu0 %4700 }
 0x4af   :  { %10685 = vmatpush3.msra.mxu0 %v3856_v1  ;;  %11554 = vrcp.f32 %v4701_v12  ;;  %10686 = vmatprep.mubr.msk.f32.mxu0 %vm11589_vm2, %v11588_v21 }
 0x4b0   :  { %10689 = vmatprep.subr.mxu0 %v11588_v21 }
 0x4b2   :  { %v4705_v25 = vpop.permute.xlu0 %4704 }
 0x4b3   :  { %v4711_v13 = vand.u32 4294901760, %v4705_v25 }
 0x4b5   :  { %v4788_v16 = vsub.f32 %v4705_v25, %v4711_v13 }
 0x4b6   :  { %10687 = vmatmul.mubr.f32.vlgmr.msra.gmra.mrb[8].mxu0 %v3843_v58 }
 0x4b7   :  { %10690 = vmatpush3.msra.mxu0 %v3778_v59  ;;  %10691 = vmatprep.mubr.msk.f32.mxu0 %vm11589_vm2, %v11588_v21  ;;  %v4789_v19 = vand.u32 4294901760, %v4788_v16 }
 0x4b8   :  { %10724 = vmatprep.subr.mxu0 %v11588_v21 }
 0x4b9   :  { %v11555_v14 = vpop.eup %11554  ;;  %v4790_v23 = vsub.f32 %v4788_v16, %v4789_v19 }
 0x4ba   :  { %v4703_v15 = vmul.f32 %v11555_v14, %v11970_v30 }
 0x4bb   :  { %v4791_v30 = vand.u32 4294901760, %v4790_v23 }
 0x4bc   :  { %v4708_v17 = vsel %vm558_vm3, %v4703_v15, 0 }
 0x4bd   :  { %v4776_v18 = vand.u32 4294901760, %v4708_v17 }
 0x4be   :  { %10692 = vmatmul.mubr.f32.vlgmr.msra.gmra.mrb[8].mxu0 %v3843_v58 }
 0x4bf   :  { %10725 = vmatpush3.msra.mxu0 %v4711_v13  ;;  %10726 = vmatprep.mubr.msk.f32.mxu0 %vm11589_vm2, %v11588_v21  ;;  %v4777_v20 = vsub.f32 %v4708_v17, %v4776_v18 }
 0x4c0   :  { %10729 = vmatprep.subr.mxu0 %v11588_v21 }
 0x4c1   :  { %v4778_v22 = vand.u32 4294901760, %v4777_v20 }
 0x4c3   :  { %v12034_v24 = vpop.f32.mrb[2].mxu0  ;;  %v4779_v27 = vsub.f32 %v4777_v20, %v4778_v22 }
 0x4c4   :  { %v10513_v28 = vpop.f32.mrb[3].mxu0 }
 0x4c5   :  { %v4780_v29 = vand.u32 4294901760, %v4779_v27 }
 0x4c7   :  { %10727 = vmatmul.mubr.f32.vlgmr.msra.gmra.mrb[10].mxu0 %v4780_v29 }
 0x4c8   :  { %10730 = vmatpush3.msra.mxu0 %v4791_v30  ;;  %10731 = vmatprep.mubr.msk.f32.mxu0 %vm11589_vm2, %v11588_v21 }
 0x4c9   :  { %10734 = vmatprep.subr.mxu0 %v11588_v21 }
 0x4cf   :  { %10732 = vmatmul.mubr.f32.vlgmr.msra.gmra.mrb[10].mxu0 %v4776_v18 }
 0x4d0   :  { %10735 = vmatpush3.msra.mxu0 %v4788_v16  ;;  %10736 = vmatprep.mubr.msk.f32.mxu0 %vm11589_vm2, %v11588_v21 }
 0x4d1   :  { %10739 = vmatprep.subr.mxu0 %v11588_v21 }
 0x4d7   :  { %10737 = vmatmul.mubr.f32.vlgmr.msra.gmra.mrb[10].mxu0 %v4777_v20 }
 0x4d8   :  { %10740 = vmatpush3.msra.mxu0 %v4711_v13  ;;  %10741 = vmatprep.mubr.msk.f32.mxu0 %vm11589_vm2, %v11588_v21 }
 0x4d9   :  { %10744 = vmatprep.subr.mxu0 %v11588_v21 }
 0x4df   :  { %10742 = vmatmul.mubr.f32.vlgmr.msra.gmra.mrb[10].mxu0 %v4778_v22 }
 0x4e0   :  { %10745 = vmatpush3.msra.mxu0 %v4789_v19  ;;  %10746 = vmatprep.mubr.msk.f32.mxu0 %vm11589_vm2, %v11588_v21 }
 0x4e1   :  { %10749 = vmatprep.subr.mxu0 %v11588_v21 }
 0x4e7   :  { %10747 = vmatmul.mubr.f32.vlgmr.msra.gmra.mrb[10].mxu0 %v4776_v18 }
 0x4e8   :  { %10750 = vmatpush3.msra.mxu0 %v4711_v13  ;;  %10751 = vmatprep.mubr.msk.f32.mxu0 %vm11589_vm2, %v11588_v21 }
 0x4e9   :  { %10784 = vmatprep.subr.mxu0 %v11588_v21 }
 0x4ef   :  { %v2385_v33 = vpop.f32.mrb[4].mxu0  ;;  %10752 = vmatmul.mubr.f32.vlgmr.msra.gmra.mrb[10].mxu0 %v4776_v18 }
 0x4f0   :  { %10785 = vmatpush3.msra.mxu0 %v5628_v32  ;;  %v10573_v34 = vpop.f32.mrb[5].mxu0  ;;  %4224 = vrot.lane.b32.xlu0 %v2385_v33, %s11601_s24 }
 0x4f1   :  { %10786 = vmatprep.mubr.msk.f32.mxu0 %vm11589_vm2, %v11588_v21  ;;  %10789 = vmatprep.subr.mxu0 %v11588_v21 }
 0x4f7   :  { %v5618_v35 = vpop.xlane.xlu0 %5617 }
 0x4f8   :  { %11556 = vrcp.f32 %v5618_v35 }
 0x502   :  { %v11557_v36 = vpop.eup %11556 }
 0x503   :  { %v5620_v38 = vmul.f32 %v11557_v36, %v11980_v51  ;;  %v6539_v51 = vpop.permute.xlu1 %6538 }
 0x504   :  { %v6545_v52 = vand.u32 4294901760, %v6539_v51 }
 0x505   :  { %v5625_v39 = vsel %vm558_vm3, %v5620_v38, 0  ;;  %v7923_v38 = vld [vmem:[%s12320_s3 + $0x8] sm:$0xff] }
 0x506   :  { %v5693_v40 = vand.u32 4294901760, %v5625_v39  ;;  %v6622_v41 = vsub.f32 %v6539_v51, %v6545_v52 }
 0x507   :  { %v7456_v4 = vpop.permute.xlu1 %7455 }
 0x508   :  { %v5694_v43 = vsub.f32 %v5625_v39, %v5693_v40  ;;  %v6623_v57 = vand.u32 4294901760, %v6622_v41  ;;  %v7462_v6 = vand.u32 4294901760, %v7456_v4 }
 0x50a   :  { %v5695_v26 = vand.u32 4294901760, %v5694_v43  ;;  %v6624_v60 = vsub.f32 %v6622_v41, %v6623_v57  ;;  %v7539_v44 = vsub.f32 %v7456_v4, %v7462_v6 }
 0x50c   :  { %v5696_v46 = vsub.f32 %v5694_v43, %v5695_v26  ;;  %v6625_v63 = vand.u32 4294901760, %v6624_v60 }
 0x50e   :  { %v5697_v47 = vand.u32 4294901760, %v5696_v46  ;;  %v7925_v46 = vld [vmem:[%s12320_s3 + $0x18] sm:$0xff] }
 0x510   :  { %10787 = vmatmul.mubr.f32.vlgmr.msra.gmra.mrb[12].mxu0 %v5697_v47  ;;  %v7947_v47 = vand.u32 4294901760, %v7924_v45 }
 0x511   :  { %10790 = vmatpush3.msra.mxu0 %v5708_v48  ;;  %10791 = vmatprep.mubr.msk.f32.mxu0 %vm11589_vm2, %v11588_v21  ;;  %v7950_v48 = vand.u32 4294901760, %v7925_v46 }
 0x512   :  { %10794 = vmatprep.subr.mxu0 %v11588_v21 }
 0x518   :  { %10792 = vmatmul.mubr.f32.vlgmr.msra.gmra.mrb[12].mxu0 %v5693_v40 }
 0x519   :  { %10795 = vmatpush3.msra.mxu0 %v5705_v37  ;;  %10796 = vmatprep.mubr.msk.f32.mxu0 %vm11589_vm2, %v11588_v21  ;;  %v7922_v37 = vld [vmem:[%s12320_s3] sm:$0xff] }
 0x51a   :  { %10799 = vmatprep.subr.mxu0 %v11588_v21  ;;  %v7941_v39 = vand.u32 4294901760, %v7922_v37 }
 0x520   :  { %10797 = vmatmul.mubr.f32.vlgmr.msra.gmra.mrb[12].mxu0 %v5694_v43  ;;  %v8031_v43 = vsub.f32 %v7922_v37, %v7941_v39 }
 0x521   :  { %10800 = vmatpush3.msra.mxu0 %v5628_v32  ;;  %10801 = vmatprep.mubr.msk.f32.mxu0 %vm11589_vm2, %v11588_v21 }
 0x522   :  { %10804 = vmatprep.subr.mxu0 %v11588_v21 }
 0x528   :  { %v6535_v49 = vpop.xlane.xlu0 %6534  ;;  %10802 = vmatmul.mubr.f32.vlgmr.msra.gmra.mrb[12].mxu0 %v5695_v26 }
 0x529   :  { %11558 = vrcp.f32 %v6535_v49  ;;  %10805 = vmatpush3.msra.mxu0 %v5706_v42  ;;  %10806 = vmatprep.mubr.msk.f32.mxu0 %vm11589_vm2, %v11588_v21  ;;  %v8032_v49 = vand.u32 4294901760, %v8031_v43 }
 0x52a   :  { %10809 = vmatprep.subr.mxu0 %v11588_v21 }
 0x52c   :  { %v7452_v0 = vpop.xlane.xlu0 %7451 }
 0x52d   :  { %11560 = vrcp.f32 %v7452_v0 }
 0x530   :  { %10807 = vmatmul.mubr.f32.vlgmr.msra.gmra.mrb[12].mxu0 %v5693_v40 }
 0x531   :  { %10810 = vmatpush3.msra.mxu0 %v5628_v32  ;;  %10811 = vmatprep.mubr.msk.f32.mxu0 %vm11589_vm2, %v11588_v21 }
 0x532   :  { %10844 = vmatprep.subr.mxu0 %v11588_v21 }
 0x533   :  { %v11559_v53 = vpop.eup %11558 }
 0x534   :  { %v6537_v54 = vmul.f32 %v11559_v53, %v12009_v50  ;;  %v7540_v50 = vand.u32 4294901760, %v7539_v44  ;;  %v8033_v53 = vsub.f32 %v8031_v43, %v8032_v49 }
 0x536   :  { %v6542_v55 = vsel %vm558_vm3, %v6537_v54, 0  ;;  %v7541_v12 = vsub.f32 %v7539_v44, %v7540_v50  ;;  %v8045_v54 = vsub.f32 %v7924_v45, %v7947_v47 }
 0x537   :  { %v6610_v56 = vand.u32 4294901760, %v6542_v55  ;;  %v11561_v1 = vpop.eup %11560 }
 0x538   :  { %10812 = vmatmul.mubr.f32.vlgmr.msra.gmra.mrb[12].mxu0 %v5693_v40  ;;  %v7454_v2 = vmul.f32 %v11561_v1, %v12013_v10  ;;  %v7542_v13 = vand.u32 4294901760, %v7541_v12  ;;  %v7944_v40 = vand.u32 4294901760, %v7923_v38 }
 0x539   :  { %10845 = vmatpush3.msra.mxu0 %v6545_v52  ;;  %10846 = vmatprep.mubr.msk.f32.mxu0 %vm11589_vm2, %v11588_v21  ;;  %v6611_v58 = vsub.f32 %v6542_v55, %v6610_v56  ;;  %v8052_v55 = vsub.f32 %v7925_v46, %v7950_v48 }
 0x53a   :  { %10849 = vmatprep.subr.mxu0 %v11588_v21  ;;  %v7459_v3 = vsel %vm558_vm3, %v7454_v2, 0  ;;  %v12137_v42 = vpack.c.bf16 %v7944_v40, %v7941_v39  ;;  %v8038_v26 = vsub.f32 %v7923_v38, %v7944_v40 }
 0x53b   :  { %v6612_v59 = vand.u32 4294901760, %v6611_v58  ;;  %v7527_v5 = vand.u32 4294901760, %v7459_v3 }
 0x53c   :  { %11163 = vmatprep.subr.bf16.mxu1 %v12137_v42  ;;  %v8039_v51 = vand.u32 4294901760, %v8038_v26  ;;  %v11178_v4 = vpack.c.bf16 %v8038_v26, %v8031_v43 }
 0x53d   :  { %v6613_v61 = vsub.f32 %v6611_v58, %v6612_v59  ;;  %v7528_v7 = vsub.f32 %v7459_v3, %v7527_v5  ;;  %11165 = vmatpush3.bf16.msra.mxu1 %v12137_v42 }
 0x53f   :  { %v6614_v62 = vand.u32 4294901760, %v6613_v61  ;;  %v7529_v8 = vand.u32 4294901760, %v7528_v7 }
 0x541   :  { %10847 = vmatmul.mubr.f32.vlgmr.msra.gmra.mrb[14].mxu0 %v6614_v62  ;;  %v7530_v11 = vsub.f32 %v7528_v7, %v7529_v8 }
 0x542   :  { %10850 = vmatpush3.msra.mxu0 %v6625_v63  ;;  %10851 = vmatprep.mubr.msk.f32.mxu0 %vm11589_vm2, %v11588_v21 }
 0x543   :  { %10854 = vmatprep.subr.mxu0 %v11588_v21  ;;  %v7531_v25 = vand.u32 4294901760, %v7530_v11 }
 0x549   :  { %10852 = vmatmul.mubr.f32.vlgmr.msra.gmra.mrb[14].mxu0 %v6610_v56 }
 0x54a   :  { %10855 = vmatpush3.msra.mxu0 %v6622_v41  ;;  %10856 = vmatprep.mubr.msk.f32.mxu0 %vm11589_vm2, %v11588_v21  ;;  %v8040_v41 = vsub.f32 %v8038_v26, %v8039_v51 }
 0x54b   :  { %10859 = vmatprep.subr.mxu0 %v11588_v21 }
 0x551   :  { %10857 = vmatmul.mubr.f32.vlgmr.msra.gmra.mrb[14].mxu0 %v6611_v58  ;;  %v8046_v58 = vand.u32 4294901760, %v8045_v54 }
 0x552   :  { %10860 = vmatpush3.msra.mxu0 %v6545_v52  ;;  %10861 = vmatprep.mubr.msk.f32.mxu0 %vm11589_vm2, %v11588_v21 }
 0x553   :  { %10864 = vmatprep.subr.mxu0 %v11588_v21  ;;  %v8047_v61 = vsub.f32 %v8045_v54, %v8046_v58 }
 0x555   :  { %v8048_v1 = vand.u32 4294901760, %v8047_v61 }
 0x559   :  { %10862 = vmatmul.mubr.f32.vlgmr.msra.gmra.mrb[14].mxu0 %v6612_v59  ;;  %v8053_v59 = vand.u32 4294901760, %v8052_v55 }
 0x55a   :  { %10865 = vmatpush3.msra.mxu0 %v6623_v57  ;;  %10866 = vmatprep.mubr.msk.f32.mxu0 %vm11589_vm2, %v11588_v21  ;;  %v8041_v57 = vand.u32 4294901760, %v8040_v41  ;;  %v10094_v41 = vld [vmem:[%s12321_s4] ss:$0 sm:$0xff] }
 0x55b   :  { %10869 = vmatprep.subr.mxu0 %v11588_v21  ;;  %v8054_v63 = vsub.f32 %v8052_v55, %v8053_v59 }
 0x55d   :  { %v8055_v2 = vand.u32 4294901760, %v8054_v63 }
 0x55f   :  { %v11174_v3 = vpack.c.bf16 %v8055_v2, %v8048_v1 }
 0x561   :  { %10867 = vmatmul.mubr.f32.vlgmr.msra.gmra.mrb[14].mxu0 %v6610_v56 }
 0x562   :  { %10870 = vmatpush3.msra.mxu0 %v6545_v52  ;;  %10871 = vmatprep.mubr.msk.f32.mxu0 %vm11589_vm2, %v11588_v21  ;;  %v4225_v18 = vpop.permute.xlu0 %4224  ;;  %v12147_v52 = vpack.c.bf16 %v7950_v48, %v7947_v47 }
 0x563   :  { %10904 = vmatprep.subr.mxu0 %v11588_v21  ;;  %v4235_v20 = vsel %vm558_vm3, %v12034_v24, %v4225_v18  ;;  %v8469_v18 = vld [vmem:[%s12322_s5 + $0x8] sm:$0xff] }
 0x564   :  { %11167 = vmatprep.subr.bf16.mxu1 %v12147_v52 }
 0x565   :  { %v3302_v9 = vpop.f32.mrb[6].mxu0  ;;  %11169 = vmatpush3.bf16.msra.mxu1 %v12147_v52 }
 0x566   :  { %v10633_v10 = vpop.f32.mrb[7].mxu0  ;;  %4228 = vrot.lane.b32.xlu1 %v3302_v9, %s11602_s25 }
 0x569   :  { %10872 = vmatmul.mubr.f32.vlgmr.msra.gmra.mrb[14].mxu0 %v6610_v56  ;;  %v8034_v56 = vand.u32 4294901760, %v8033_v53 }
 0x56a   :  { %10905 = vmatpush3.msra.mxu0 %v7462_v6  ;;  %10906 = vmatprep.mubr.msk.f32.mxu0 %vm11589_vm2, %v11588_v21 }
 0x56b   :  { %10909 = vmatprep.subr.mxu0 %v11588_v21  ;;  %v11170_v60 = vpack.c.bf16 %v8041_v57, %v8034_v56 }
 0x56d   :  { %10907 = vmatmul.mubr.f32.vlgmr.msra.gmra.mrb[16].mxu0 %v7531_v25  ;;  %11171 = vmatprep.subr.bf16.mxu1 %v11170_v60 }
 0x56e   :  { %10910 = vmatpush3.msra.mxu0 %v7542_v13  ;;  %10911 = vmatprep.mubr.msk.f32.mxu0 %vm11589_vm2, %v11588_v21 }
 0x56f   :  { %10914 = vmatprep.subr.mxu0 %v11588_v21 }
 0x575   :  { %10912 = vmatmul.mubr.f32.vlgmr.msra.gmra.mrb[16].mxu0 %v7527_v5 }
 0x576   :  { %10915 = vmatpush3.msra.mxu0 %v7539_v44  ;;  %10916 = vmatprep.mubr.msk.f32.mxu0 %vm11589_vm2, %v11588_v21 }
 0x577   :  { %10919 = vmatprep.subr.mxu0 %v11588_v21 }
 0x57d   :  { %10917 = vmatmul.mubr.f32.vlgmr.msra.gmra.mrb[16].mxu0 %v7528_v7  ;;  %v11198_v7 = vpack.c.bf16 %v8053_v59, %v8046_v58 }
 0x57e   :  { %10920 = vmatpush3.msra.mxu0 %v7462_v6  ;;  %10921 = vmatprep.mubr.msk.f32.mxu0 %vm11589_vm2, %v11588_v21 }
 0x57f   :  { %10924 = vmatprep.subr.mxu0 %v11588_v21 }
 0x585   :  { %10922 = vmatmul.mubr.f32.vlgmr.msra.gmra.mrb[16].mxu0 %v7529_v8 }
 0x586   :  { %10925 = vmatpush3.msra.mxu0 %v7540_v50  ;;  %10926 = vmatprep.mubr.msk.f32.mxu0 %vm11589_vm2, %v11588_v21 }
 0x587   :  { %10929 = vmatprep.subr.mxu0 %v11588_v21 }
 0x58d   :  { %10927 = vmatmul.mubr.f32.vlgmr.msra.gmra.mrb[16].mxu0 %v7527_v5 }
 0x58e   :  { %10930 = vmatpush3.msra.mxu0 %v7462_v6  ;;  %10931 = vmatprep.mubr.msk.f32.mxu0 %vm11589_vm2, %v11588_v21  ;;  %v11194_v6 = vpack.c.bf16 %v8039_v51, %v8032_v49 }
 0x591   :  { %v4219_v14 = vpop.f32.mrb[8].mxu0 }
 0x592   :  { %v10693_v15 = vpop.f32.mrb[9].mxu0  ;;  %4232 = vrot.lane.b32.xlu1 %v4219_v14, %s11603_s26 }
 0x595   :  { %10932 = vmatmul.mubr.f32.vlgmr.msra.gmra.mrb[16].mxu0 %v7527_v5  ;;  %v11182_v5 = vpack.c.bf16 %v8052_v55, %v8045_v54 }
 0x5c2   :  { %v12113_v16 = vpop.f32.mrb[10].mxu0 }
 0x5c3   :  { %v10753_v17 = vpop.f32.mrb[11].mxu0 }
 0x5d8   :  { %v4229_v19 = vpop.permute.xlu1 %4228 }
 0x5d9   :  { %v4237_v22 = vsel %vm4236_vm4, %v4235_v20, %v4229_v19  ;;  %v8489_v20 = vand.u32 4294901760, %v8469_v18 }
 0x604   :  { %v4233_v23 = vpop.permute.xlu1 %4232 }
 0x605   :  { %v4239_v27 = vsel %vm4238_vm5, %v4237_v22, %v4233_v23 }
 0x606   :  { %v7935_v28 = vsel %vm7933_vm6, %v4239_v27, 0  ;;  %v8583_v27 = vsub.f32 %v8469_v18, %v8489_v20 }
 0x607   :  { %v12120_v29 = vand.u32 4294901760, %v7935_v28 }
 0x609   :  { %v12123_v30 = vsub.f32 %v7935_v28, %v12120_v29  ;;  %v8470_v28 = vld [vmem:[%s12322_s5 + $0x10] sm:$0xff] }
 0x60b   :  { %v6069_v31 = vpop.f32.mrb[12].mxu0  ;;  %v8011_v32 = vand.u32 4294901760, %v12123_v30 }
 0x60c   :  { %7908 = vrot.lane.b32.xlu1 %v6069_v31, %s11601_s24  ;;  %v10813_v33 = vpop.f32.mrb[13].mxu0 }
 0x60d   :  { %v8012_v24 = vsub.f32 %v12123_v30, %v8011_v32  ;;  %v8584_v33 = vand.u32 4294901760, %v8583_v27 }
 0x60f   :  { %v8013_v34 = vand.u32 4294901760, %v8012_v24 }
 0x611   :  { %10942 = vmatprep.mubr.f32.mxu1 %v8013_v34 }
 0x63c   :  { %v6986_v35 = vpop.f32.mrb[14].mxu0 }
 0x63d   :  { %7912 = vrot.lane.b32.xlu1 %v6986_v35, %s11602_s25  ;;  %v10873_v36 = vpop.f32.mrb[15].mxu0  ;;  %v8585_v35 = vsub.f32 %v8583_v27, %v8584_v33 }
 0x63f   :  { %v8586_v39 = vand.u32 4294901760, %v8585_v35 }
 0x668   :  { %v7903_v62 = vpop.f32.mrb[16].mxu0 }
 0x669   :  { %7916 = vrot.lane.b32.xlu1 %v7903_v62, %s11603_s26  ;;  %v10933_v0 = vpop.f32.mrb[17].mxu0 }
 0x67e   :  { %v7909_v44 = vpop.permute.xlu1 %7908 }
 0x67f   :  { %v7919_v50 = vsel %vm558_vm3, %v12113_v16, %v7909_v44  ;;  %v8468_v16 = vld [vmem:[%s12322_s5] sm:$0xff] }
 0x680   :  { %v8486_v19 = vand.u32 4294901760, %v8468_v16 }
 0x682   :  { %v12179_v22 = vpack.c.bf16 %v8489_v20, %v8486_v19  ;;  %v8576_v23 = vsub.f32 %v8468_v16, %v8486_v19 }
 0x684   :  { %11211 = vmatprep.subr.bf16.mxu0 %v12179_v22  ;;  %v11226_v49 = vpack.c.bf16 %v8583_v27, %v8576_v23  ;;  %v11604_v27 = vmov 0.0|0.0  }
 0x685   :  { %11213 = vmatpush3.bf16.msra.mxu0 %v12179_v22 }
 0x6af   :  { %v7913_v8 = vpop.permute.xlu1 %7912 }
 0x6b0   :  { %v7920_v9 = vsel %vm4236_vm4, %v7919_v50, %v7913_v8 }
 0x6db   :  { %v7917_v10 = vpop.permute.xlu1 %7916 }
 0x6dc   :  { %v7921_v11 = vsel %vm4238_vm5, %v7920_v9, %v7917_v10 }
 0x6dd   :  { %v7938_v12 = vsel %vm7933_vm6, %v7921_v11, 0 }
 0x6de   :  { %v8019_v25 = vand.u32 4294901760, %v7938_v12 }
 0x6e0   :  { %v8020_v13 = vsub.f32 %v7938_v12, %v8019_v25 }
 0x6e2   :  { %v8021_v14 = vand.u32 4294901760, %v8020_v13 }
 0x6e4   :  { %v8022_v15 = vsub.f32 %v8020_v13, %v8021_v14 }
 0x6e6   :  { %v8023_v17 = vand.u32 4294901760, %v8022_v15 }
 0x6e8   :  { %10943 = vmatmul.mubr.f32.vlgmr.msra.gmra.mrb[16].mxu1 %v8023_v17 }
 0x6e9   :  { %11173 = vmatpush3.bf16.msra.mxu1 %v11170_v60  ;;  %10953 = vmatprep.mubr.f32.mxu1 %v12120_v29 }
 0x6ea   :  { %11175 = vmatprep.subr.bf16.mxu1 %v11174_v3 }
 0x6ed   :  { %11177 = vmatpush3.bf16.msra.mxu1 %v11174_v3 }
 0x6ee   :  { %11179 = vmatprep.subr.bf16.mxu1 %v11178_v4 }
 0x6f0   :  { %10954 = vmatmul.mubr.f32.vlgmr.msra.gmra.mrb[16].mxu1 %v8019_v25 }
 0x6f1   :  { %11181 = vmatpush3.bf16.msra.mxu1 %v11178_v4  ;;  %10964 = vmatprep.mubr.f32.mxu1 %v12123_v30  ;;  %v8492_v30 = vand.u32 4294901760, %v8470_v28 }
 0x6f2   :  { %11183 = vmatprep.subr.bf16.mxu1 %v11182_v5 }
 0x6f3   :  { %v8590_v36 = vsub.f32 %v8470_v28, %v8492_v30 }
 0x6f5   :  { %11185 = vmatpush3.bf16.msra.mxu1 %v11182_v5  ;;  %v8591_v40 = vand.u32 4294901760, %v8590_v36 }
 0x6f6   :  { %11187 = vmatprep.subr.bf16.mxu1 %v12137_v42 }
 0x6f7   :  { %v8592_v26 = vsub.f32 %v8590_v36, %v8591_v40 }
 0x6f8   :  { %10965 = vmatmul.mubr.f32.vlgmr.msra.gmra.mrb[16].mxu1 %v8020_v13  ;;  %v9081_v13 = vld [vmem:[%s12324_s7] sm:$0xff] }
 0x6f9   :  { %11189 = vmatpush3.bf16.msra.mxu1 %v12137_v42  ;;  %10975 = vmatprep.mubr.f32.mxu1 %v8011_v32  ;;  %v8577_v32 = vand.u32 4294901760, %v8576_v23  ;;  %v8593_v46 = vand.u32 4294901760, %v8592_v26  ;;  %v9096_v17 = vand.u32 4294901760, %v9081_v13 }
 0x6fa   :  { %11191 = vmatprep.subr.bf16.mxu1 %v12147_v52 }
 0x6fb   :  { %v8578_v34 = vsub.f32 %v8576_v23, %v8577_v32  ;;  %v12224_v19 = vsub.f32 %v9081_v13, %v9096_v17  ;;  %v9084_v23 = vld [vmem:[%s12324_s7 + $0x18] sm:$0xff] }
 0x6fd   :  { %11193 = vmatpush3.bf16.msra.mxu1 %v12147_v52  ;;  %v8579_v38 = vand.u32 4294901760, %v8578_v34 }
 0x6fe   :  { %11195 = vmatprep.subr.bf16.mxu1 %v11194_v6 }
 0x6ff   :  { %v11218_v43 = vpack.c.bf16 %v8586_v39, %v8579_v38 }
 0x700   :  { %10976 = vmatmul.mubr.f32.vlgmr.msra.gmra.mrb[16].mxu1 %v8021_v14  ;;  %v9082_v14 = vld [vmem:[%s12324_s7 + $0x8] sm:$0xff] }
 0x701   :  { %11197 = vmatpush3.bf16.msra.mxu1 %v11194_v6  ;;  %10986 = vmatprep.mubr.f32.mxu1 %v12120_v29  ;;  %v10095_v6 = vld [vmem:[%s12323_s6] ss:$0 sm:$0xff]  ;;  %v9099_v16 = vand.u32 4294901760, %v9082_v14 }
 0x702   :  { %11199 = vmatprep.subr.bf16.mxu1 %v11198_v7 }
 0x703   :  { %v12222_v18 = vpack.c.bf16 %v9099_v16, %v9096_v17  ;;  %v9183_v20 = vsub.f32 %v9082_v14, %v9099_v16 }
 0x705   :  { %11201 = vmatpush3.bf16.msra.mxu1 %v11198_v7 }
 0x706   :  { %11203 = vmatprep.subr.bf16.mxu1 %v12137_v42 }
 0x708   :  { %10987 = vmatmul.mubr.f32.vlgmr.msra.gmra.mrb[16].mxu1 %v8019_v25 }
 0x709   :  { %11205 = vmatpush3.bf16.msra.mxu1 %v12137_v42  ;;  %10997 = vmatprep.mubr.f32.mxu1 %v12120_v29  ;;  %v8471_v29 = vld [vmem:[%s12322_s5 + $0x18] sm:$0xff] }
 0x70a   :  { %11207 = vmatprep.subr.bf16.mxu1 %v12147_v52  ;;  %v8495_v31 = vand.u32 4294901760, %v8471_v29 }
 0x70c   :  { %v12189_v24 = vpack.c.bf16 %v8495_v31, %v8492_v30  ;;  %v8597_v37 = vsub.f32 %v8471_v29, %v8495_v31  ;;  %v9105_v29 = vand.u32 4294901760, %v9084_v23  ;;  %v9177_v30 = vand.u32 4294901760, %v12224_v19 }
 0x70d   :  { %11209 = vmatpush3.bf16.msra.mxu1 %v12147_v52  ;;  %v11242_v52 = vpack.c.bf16 %v8584_v33, %v8577_v32  ;;  %v9184_v31 = vand.u32 4294901760, %v9183_v20 }
 0x70e   :  { %11215 = vmatprep.subr.bf16.mxu0 %v12189_v24  ;;  %v8598_v42 = vand.u32 4294901760, %v8597_v37  ;;  %v11230_v51 = vpack.c.bf16 %v8597_v37, %v8590_v36  ;;  %11258 = vmatprep.subr.bf16.mxu1 %v11604_v27  ;;  %v9178_v34 = vsub.f32 %v12224_v19, %v9177_v30 }
 0x70f   :  { %11217 = vmatpush3.bf16.msra.mxu0 %v12189_v24  ;;  %v9185_v35 = vsub.f32 %v9183_v20, %v9184_v31 }
 0x710   :  { %10998 = vmatmul.mubr.f32.vlgmr.msra.gmra.mrb[16].mxu1 %v8019_v25  ;;  %v8599_v45 = vsub.f32 %v8597_v37, %v8598_v42  ;;  %11219 = vmatprep.subr.bf16.mxu0 %v11218_v43  ;;  %v11246_v53 = vpack.c.bf16 %v8598_v42, %v8591_v40  ;;  %v9179_v36 = vand.u32 4294901760, %v9178_v34 }
 0x711   :  { %11074 = vmatprep.mubr.msk.f32.mxu1 %vm11589_vm2, %v11588_v21  ;;  %11260 = vmatpush3.bf16.msra.mxu1 %v12222_v18  ;;  %v9186_v37 = vand.u32 4294901760, %v9185_v35  ;;  %v10098_v35 = vld [vmem:[%s12327_s10] ss:$0 sm:$0xff] }
 0x712   :  { %v8600_v47 = vand.u32 4294901760, %v8599_v45  ;;  %11261 = vmatprep.subr.bf16.mxu1 %v11604_v27 }
 0x713   :  { %v11265_v40 = vpack.c.bf16 %v9186_v37, %v9179_v36 }
 0x714   :  { %v11222_v48 = vpack.c.bf16 %v8600_v47, %v8593_v46  ;;  %v11271_v47 = vpack.c.bf16 %v9183_v20, %v12224_v19 }
 0x7e3   :  { %v10999_v54 = vpop.f32.mrb[16].mxu1 }
 0x7e4   :  { %v11296_v55 = vadd.f32 %v10999_v54, %v10094_v41  ;;  %v8458_v56 = vpop.f32.mrb[17].mxu1 }
 0x7e5   :  { %v11297_v57 = vadd.f32 %v10094_v41, %v8458_v56 }
 0x7e6   :  { %v8483_v58 = vsel %vm7933_vm6, %v11296_v55, 0 }
 0x7e7   :  { %v8564_v59 = vand.u32 4294901760, %v8483_v58  ;;  %v8480_v60 = vsel %vm7933_vm6, %v11297_v57, 0 }
 0x7e8   :  { %v8554_v61 = vand.u32 4294901760, %v8480_v60 }
 0x7e9   :  { %v8565_v62 = vsub.f32 %v8483_v58, %v8564_v59 }
 0x7ea   :  { %v8555_v63 = vsub.f32 %v8480_v60, %v8554_v61 }
 0x7eb   :  { %v8566_v0 = vand.u32 4294901760, %v8565_v62 }
 0x7ec   :  { %v8556_v1 = vand.u32 4294901760, %v8555_v63 }
 0x7ed   :  { %v8567_v2 = vsub.f32 %v8565_v62, %v8566_v0 }
 0x7ee   :  { %v8557_v3 = vsub.f32 %v8555_v63, %v8556_v1 }
 0x7ef   :  { %v8568_v5 = vand.u32 4294901760, %v8567_v2 }
 0x7f0   :  { %v8558_v4 = vand.u32 4294901760, %v8557_v3 }
 0x7f2   :  { %11008 = vmatprep.mubr.f32.mxu0 %v8558_v4 }
 0x7f3   :  { %11009 = vmatmul.mubr.f32.vlgmr.msra.gmra.mrb[18].mxu0 %v8568_v5 }
 0x7f4   :  { %11221 = vmatpush3.bf16.msra.mxu0 %v11218_v43  ;;  %11019 = vmatprep.mubr.f32.mxu0 %v8554_v61 }
 0x7f5   :  { %11223 = vmatprep.subr.bf16.mxu0 %v11222_v48 }
 0x7f8   :  { %11225 = vmatpush3.bf16.msra.mxu0 %v11222_v48 }
 0x7f9   :  { %11227 = vmatprep.subr.bf16.mxu0 %v11226_v49 }
 0x7fb   :  { %11020 = vmatmul.mubr.f32.vlgmr.msra.gmra.mrb[18].mxu0 %v8564_v59 }
 0x7fc   :  { %11229 = vmatpush3.bf16.msra.mxu0 %v11226_v49  ;;  %11030 = vmatprep.mubr.f32.mxu0 %v8555_v63  ;;  %v11283_v49 = vpack.c.bf16 %v9184_v31, %v9177_v30 }
 0x7fd   :  { %11231 = vmatprep.subr.bf16.mxu0 %v11230_v51 }
 0x800   :  { %11233 = vmatpush3.bf16.msra.mxu0 %v11230_v51 }
 0x801   :  { %11235 = vmatprep.subr.bf16.mxu0 %v12179_v22 }
 0x803   :  { %11031 = vmatmul.mubr.f32.vlgmr.msra.gmra.mrb[18].mxu0 %v8565_v62 }
 0x804   :  { %11237 = vmatpush3.bf16.msra.mxu0 %v12179_v22  ;;  %11041 = vmatprep.mubr.f32.mxu0 %v8556_v1 }
 0x805   :  { %11239 = vmatprep.subr.bf16.mxu0 %v12189_v24 }
 0x808   :  { %11241 = vmatpush3.bf16.msra.mxu0 %v12189_v24 }
 0x809   :  { %11243 = vmatprep.subr.bf16.mxu0 %v11242_v52 }
 0x80b   :  { %11042 = vmatmul.mubr.f32.vlgmr.msra.gmra.mrb[18].mxu0 %v8566_v0 }
 0x80c   :  { %11245 = vmatpush3.bf16.msra.mxu0 %v11242_v52  ;;  %11052 = vmatprep.mubr.f32.mxu0 %v8554_v61 }
 0x80d   :  { %11247 = vmatprep.subr.bf16.mxu0 %v11246_v53 }
 0x810   :  { %11249 = vmatpush3.bf16.msra.mxu0 %v11246_v53 }
 0x811   :  { %11251 = vmatprep.subr.bf16.mxu0 %v12179_v22 }
 0x813   :  { %11053 = vmatmul.mubr.f32.vlgmr.msra.gmra.mrb[18].mxu0 %v8564_v59 }
 0x814   :  { %11253 = vmatpush3.bf16.msra.mxu0 %v12179_v22  ;;  %11063 = vmatprep.mubr.f32.mxu0 %v8554_v61  ;;  %v9083_v22 = vld [vmem:[%s12324_s7 + $0x10] sm:$0xff] }
 0x815   :  { %11255 = vmatprep.subr.bf16.mxu0 %v12189_v24  ;;  %v9102_v28 = vand.u32 4294901760, %v9083_v22 }
 0x817   :  { %v12236_v32 = vpack.c.bf16 %v9105_v29, %v9102_v28  ;;  %v9190_v33 = vsub.f32 %v9083_v22, %v9102_v28 }
 0x818   :  { %11257 = vmatpush3.bf16.msra.mxu0 %v12189_v24  ;;  %v9197_v24 = vsub.f32 %v9084_v23, %v9105_v29 }
 0x819   :  { %11132 = vmatprep.subr.mxu0 %v11588_v21  ;;  %11263 = vmatpush3.bf16.msra.mxu1 %v12236_v32  ;;  %v9191_v38 = vand.u32 4294901760, %v9190_v33 }
 0x81a   :  { %v9198_v39 = vand.u32 4294901760, %v9197_v24  ;;  %11264 = vmatprep.subr.bf16.mxu1 %v11604_v27  ;;  %v11274_v48 = vpack.c.bf16 %v9197_v24, %v9190_v33 }
 0x81b   :  { %11064 = vmatmul.mubr.f32.vlgmr.msra.gmra.mrb[18].mxu0 %v8564_v59  ;;  %v9192_v42 = vsub.f32 %v9190_v33, %v9191_v38 }
 0x81c   :  { %11134 = vmatprep.mubr.msk.f32.mxu0 %vm11589_vm2, %v11588_v21  ;;  %v9199_v43 = vsub.f32 %v9197_v24, %v9198_v39  ;;  %v11286_v51 = vpack.c.bf16 %v9198_v39, %v9191_v38  ;;  %v10097_v24 = vld [vmem:[%s12326_s9] ss:$0 sm:$0xff] }
 0x81d   :  { %v9193_v26 = vand.u32 4294901760, %v9192_v42 }
 0x81e   :  { %v9200_v45 = vand.u32 4294901760, %v9199_v43 }
 0x820   :  { %v11268_v46 = vpack.c.bf16 %v9200_v45, %v9193_v26 }
 0x8ee   :  { %v11065_v7 = vpop.f32.mrb[18].mxu0 }
 0x8ef   :  { %v9003_v44 = vpop.f32.mrb[19].mxu0  ;;  %v11298_v50 = vadd.f32 %v11065_v7, %v10095_v6  ;;  %v9620_v7 = vld [vmem:[%s12328_s11] sm:$0xff] }
 0x8f0   :  { %v11299_v8 = vadd.f32 %v10095_v6, %v9003_v44  ;;  %v9632_v44 = vand.u32 4294901760, %v9620_v7 }
 0x8f1   :  { %v9014_v10 = vmax.f32 %v11298_v50, 0.0 }
 0x8f2   :  { %v9013_v9 = vmax.f32 %v11299_v8, 0.0  ;;  %11133 = vmatpush3.msra.mxu0 %v9632_v44  ;;  %v10096_v8 = vld [vmem:[%s12325_s8] ss:$0 sm:$0xff]  ;;  %v9709_v38 = vsub.f32 %v9620_v7, %v9632_v44 }
 0x8f3   :  { %11137 = vmatprep.subr.mxu0 %v11588_v21 }
 0x8f4   :  { %9015 = vxpose.xlu0.b32.start [1/2] (short) (narrow) %v9013_v9, 8  ;;  %v9710_v42 = vand.u32 4294901760, %v9709_v38 }
 0x8f6   :  { %v9711_v45 = vsub.f32 %v9709_v38, %v9710_v42 }
 0x8f8   :  { %9016 = vxpose.xlu0.b32.end [2/2] (short) (narrow) %v9014_v10, 8 }
 0x974   :  { %v9031_v11 = vpop.trf.xlu0 }
 0x975   :  { %9063 = vrot.lane.b32.xlu1 %v9031_v11, %s11593_s17  ;;  %v9052_v12 = vrot.slane %v9031_v11, 2  ;;  %v9048_v25 = vrot.slane %v9031_v11, 1  ;;  %v9056_v15 = vrot.slane %v9031_v11, 3 }
 0x979   :  { %9067 = vrot.lane.b32.xlu1 %v9052_v12, %s11601_s24 }
 0x97d   :  { %9049 = vrot.lane.b32.xlu1 %v9048_v25, %s11601_s24 }
 0x981   :  { %9070 = vrot.lane.b32.xlu1 %v9056_v15, %s11602_s25 }
 0x985   :  { %9053 = vrot.lane.b32.xlu1 %v9052_v12, %s11602_s25 }
 0x989   :  { %9057 = vrot.lane.b32.xlu1 %v9056_v15, %s11603_s26 }
 0x9e7   :  { %v9064_v52 = vpop.permute.xlu1 %9063 }
 0x9e8   :  { %v9073_v55 = vsel %vm558_vm3, %v9064_v52, %v9048_v25 }
 0x9eb   :  { %v9068_v53 = vpop.permute.xlu1 %9067 }
 0x9ec   :  { %v9074_v56 = vsel %vm4236_vm4, %v9073_v55, %v9068_v53 }
 0x9ef   :  { %v9050_v41 = vpop.permute.xlu1 %9049 }
 0x9f0   :  { %v9060_v59 = vsel %vm558_vm3, %v9031_v11, %v9050_v41 }
 0x9f3   :  { %v9071_v54 = vpop.permute.xlu1 %9070 }
 0x9f4   :  { %v9075_v58 = vsel %vm4238_vm5, %v9074_v56, %v9071_v54 }
 0x9f5   :  { %v9077_v60 = vrot.slane %v9075_v58, 7 }
 0x9f7   :  { %v9054_v57 = vpop.permute.xlu1 %9053 }
 0x9f8   :  { %v9061_v61 = vsel %vm4236_vm4, %v9060_v59, %v9054_v57 }
 0x9fb   :  { %v9058_v62 = vpop.permute.xlu1 %9057 }
 0x9fc   :  { %v9062_v63 = vsel %vm4238_vm5, %v9061_v61, %v9058_v62 }
 0x9fd   :  { %v9080_v0 = vsel %vm9079_vm7, %v9062_v63, %v9077_v60 }
 0x9fe   :  { %v9093_v1 = vsel %vm7933_vm6, %v9080_v0, 0 }
 0x9ff   :  { %v9164_v2 = vand.u32 4294901760, %v9093_v1 }
 0xa01   :  { %v9165_v3 = vsub.f32 %v9093_v1, %v9164_v2 }
 0xa03   :  { %v9166_v4 = vand.u32 4294901760, %v9165_v3 }
 0xa05   :  { %v9167_v5 = vsub.f32 %v9165_v3, %v9166_v4 }
 0xa07   :  { %v9168_v6 = vand.u32 4294901760, %v9167_v5 }
 0xa09   :  { %11075 = vmatmul.mubr.f32.vlgmr.msra.gmra.mrb[18].mxu1 %v9168_v6 }
 0xa0a   :  { %11266 = vmatpush3.bf16.msra.mxu1 %v11265_v40  ;;  %11085 = vmatprep.mubr.msk.f32.mxu1 %vm11589_vm2, %v11588_v21 }
 0xa0b   :  { %11267 = vmatprep.subr.bf16.mxu1 %v11604_v27 }
 0xa0e   :  { %11269 = vmatpush3.bf16.msra.mxu1 %v11268_v46 }
 0xa0f   :  { %11270 = vmatprep.subr.bf16.mxu1 %v11604_v27 }
 0xa11   :  { %11086 = vmatmul.mubr.f32.vlgmr.msra.gmra.mrb[18].mxu1 %v9164_v2 }
 0xa12   :  { %11272 = vmatpush3.bf16.msra.mxu1 %v11271_v47  ;;  %11096 = vmatprep.mubr.msk.f32.mxu1 %vm11589_vm2, %v11588_v21 }
 0xa13   :  { %11273 = vmatprep.subr.bf16.mxu1 %v11604_v27 }
 0xa16   :  { %11275 = vmatpush3.bf16.msra.mxu1 %v11274_v48  ;;  %v9712_v48 = vand.u32 4294901760, %v9711_v45 }
 0xa17   :  { %11276 = vmatprep.subr.bf16.mxu1 %v11604_v27 }
 0xa19   :  { %11097 = vmatmul.mubr.f32.vlgmr.msra.gmra.mrb[18].mxu1 %v9165_v3 }
 0xa1a   :  { %11278 = vmatpush3.bf16.msra.mxu1 %v12222_v18  ;;  %11107 = vmatprep.mubr.msk.f32.mxu1 %vm11589_vm2, %v11588_v21 }
 0xa1b   :  { %11279 = vmatprep.subr.bf16.mxu1 %v11604_v27 }
 0xa1e   :  { %11281 = vmatpush3.bf16.msra.mxu1 %v12236_v32 }
 0xa1f   :  { %11282 = vmatprep.subr.bf16.mxu1 %v11604_v27 }
 0xa21   :  { %11108 = vmatmul.mubr.f32.vlgmr.msra.gmra.mrb[18].mxu1 %v9166_v4 }
 0xa22   :  { %11284 = vmatpush3.bf16.msra.mxu1 %v11283_v49  ;;  %11118 = vmatprep.mubr.msk.f32.mxu1 %vm11589_vm2, %v11588_v21 }
 0xa23   :  { %11285 = vmatprep.subr.bf16.mxu1 %v11604_v27 }
 0xa26   :  { %11287 = vmatpush3.bf16.msra.mxu1 %v11286_v51  ;;  %v10099_v51 = vld [vmem:[%s12329_s12] ss:$0 sm:$0xff] }
 0xa27   :  { %11288 = vmatprep.subr.bf16.mxu1 %v11604_v27 }
 0xa29   :  { %11119 = vmatmul.mubr.f32.vlgmr.msra.gmra.mrb[18].mxu1 %v9164_v2 }
 0xa2a   :  { %11290 = vmatpush3.bf16.msra.mxu1 %v12222_v18  ;;  %11129 = vmatprep.mubr.msk.f32.mxu1 %vm11589_vm2, %v11588_v21 }
 0xa2b   :  { %11291 = vmatprep.subr.bf16.mxu1 %v11604_v27 }
 0xa2e   :  { %11293 = vmatpush3.bf16.msra.mxu1 %v12236_v32 }
 0xa31   :  { %11130 = vmatmul.mubr.f32.vlgmr.msra.gmra.mrb[18].mxu1 %v9164_v2 }
 0xb04   :  { %v9576_v50 = vpop.f32.mrb[18].mxu1 }
 0xb05   :  { %v11300_v9 = vadd.f32 %v10096_v8, %v9576_v50  ;;  %v11131_v10 = vpop.f32.mrb[19].mxu1 }
 0xb07   :  { %v9581_v11 = vsel %vm9580_vm8, %v11300_v9, 0.0 }
 0xb08   :  { %v9582_v12 = vrot.slane %v9581_v11, 4 }
 0xb0a   :  { %v9583_v25 = vadd.f32 %v9582_v12, %v9581_v11 }
 0xb0c   :  { %v9584_v13 = vrot.slane %v9583_v25, 2 }
 0xb0e   :  { %v9585_v14 = vadd.f32 %v9584_v13, %v9583_v25 }
 0xb10   :  { %v9586_v15 = vrot.slane %v9585_v14, 1 }
 0xb12   :  { %v9587_v17 = vadd.f32 %v9586_v15, %v9585_v14 }
 0xb14   :  { %v9589_v16 = vmul.f32 0.5, %v9587_v17 }
 0xb16   :  { %v9590_v18 = vsub.f32 %v11300_v9, %v9589_v16 }
 0xb18   :  { %v9591_v19 = vmul.f32 %v9590_v18, %v9590_v18 }
 0xb1a   :  { %v9592_v20 = vsel %vm9580_vm8, %v9591_v19, 0.0 }
 0xb1b   :  { %v9593_v22 = vrot.slane %v9592_v20, 4 }
 0xb1d   :  { %v9594_v23 = vadd.f32 %v9593_v22, %v9592_v20 }
 0xb1f   :  { %v9595_v27 = vrot.slane %v9594_v23, 2 }
 0xb21   :  { %v9596_v28 = vadd.f32 %v9595_v27, %v9594_v23 }
 0xb23   :  { %v9597_v29 = vrot.slane %v9596_v28, 1 }
 0xb25   :  { %v9598_v30 = vadd.f32 %v9597_v29, %v9596_v28 }
 0xb27   :  { %v9599_v31 = vmul.f32 0.5, %v9598_v30 }
 0xb29   :  { %v9600_v32 = vadd.f32 1e-05, %v9599_v31 }
 0xb2b   :  { %11562 = vrsqrt.f32 %v9600_v32 }
 0xb35   :  { %v11563_v33 = vpop.eup %11562 }
 0xb36   :  { %v9602_v34 = vmul.f32 %v11563_v33, %v9590_v18 }
 0xb38   :  { %v9610_v36 = vmul.f32 %v10097_v24, %v9602_v34 }
 0xb3a   :  { %v9618_v37 = vadd.f32 %v10098_v35, %v9610_v36 }
 0xb3c   :  { %v9619_v39 = vmax.f32 %v9618_v37, 0.0 }
 0xb3e   :  { %v9629_v40 = vsel %vm558_vm3, %v9619_v39, 0 }
 0xb3f   :  { %v9697_v43 = vand.u32 4294901760, %v9629_v40 }
 0xb41   :  { %v9698_v26 = vsub.f32 %v9629_v40, %v9697_v43 }
 0xb43   :  { %v9699_v46 = vand.u32 4294901760, %v9698_v26 }
 0xb45   :  { %v9700_v47 = vsub.f32 %v9698_v26, %v9699_v46 }
 0xb47   :  { %v9701_v49 = vand.u32 4294901760, %v9700_v47 }
 0xb49   :  { %11135 = vmatmul.mubr.f32.vlgmr.msra.gmra.mrb[20].mxu0 %v9701_v49 }
 0xb4a   :  { %11138 = vmatpush3.msra.mxu0 %v9712_v48  ;;  %11139 = vmatprep.mubr.msk.f32.mxu0 %vm11589_vm2, %v11588_v21 }
 0xb4b   :  { %11142 = vmatprep.subr.mxu0 %v11588_v21 }
 0xb51   :  { %11140 = vmatmul.mubr.f32.vlgmr.msra.gmra.mrb[20].mxu0 %v9697_v43 }
 0xb52   :  { %11143 = vmatpush3.msra.mxu0 %v9709_v38  ;;  %11144 = vmatprep.mubr.msk.f32.mxu0 %vm11589_vm2, %v11588_v21 }
 0xb53   :  { %11147 = vmatprep.subr.mxu0 %v11588_v21 }
 0xb59   :  { %11145 = vmatmul.mubr.f32.vlgmr.msra.gmra.mrb[20].mxu0 %v9698_v26 }
 0xb5a   :  { %11148 = vmatpush3.msra.mxu0 %v9632_v44  ;;  %11149 = vmatprep.mubr.msk.f32.mxu0 %vm11589_vm2, %v11588_v21 }
 0xb5b   :  { %11152 = vmatprep.subr.mxu0 %v11588_v21 }
 0xb61   :  { %11150 = vmatmul.mubr.f32.vlgmr.msra.gmra.mrb[20].mxu0 %v9699_v46 }
 0xb62   :  { %11153 = vmatpush3.msra.mxu0 %v9710_v42  ;;  %11154 = vmatprep.mubr.msk.f32.mxu0 %vm11589_vm2, %v11588_v21 }
 0xb63   :  { %11157 = vmatprep.subr.mxu0 %v11588_v21 }
 0xb69   :  { %11155 = vmatmul.mubr.f32.vlgmr.msra.gmra.mrb[20].mxu0 %v9697_v43 }
 0xb6a   :  { %11158 = vmatpush3.msra.mxu0 %v9632_v44  ;;  %11159 = vmatprep.mubr.msk.f32.mxu0 %vm11589_vm2, %v11588_v21 }
 0xb71   :  { %11160 = vmatmul.mubr.f32.vlgmr.msra.gmra.mrb[20].mxu0 %v9697_v43 }
 0xc44   :  { %v10073_v52 = vpop.f32.mrb[20].mxu0 }
 0xc45   :  { %v11301_v53 = vadd.f32 %v10099_v51, %v10073_v52  ;;  %v11161_v41 = vpop.f32.mrb[21].mxu0 }
 0xc47   :  { %10078 = vst.msk [vmem:[#allocation2] sm:$0x3] %vm10077_vm9, %v11301_v53 }
 0xc48   :  { %11575 = shalt.err (!%p11572_p4)
}
 0xc49   :  { %s11576_s21 = scalar_lea.hbm %s12330_s13, 32 }
 0xc4a   :  { %p11577_p5 = scmp.ne.s32.totalorder %s12330_s13, %s11576_s21  ;;  %p11580_p6 = scmp.lt.u32.totalorder %s11576_s21, %s12330_s13 }
 0xc4c   :  { %p11582_p7 = pnand %p11580_p6, %p11577_p5 }
 0xc4e   :  { %11585 = shalt.err (!%p11582_p7)
}
 0xc4f   :  { %10088 = dma.vmem_to_hbm [thread:$0]  %s10086_s18, 32, %s12330_s13, [#allocation3]  }
 0xc50   :  { %11586 = dma.done.wait [#allocation3], 32  }
 0xc51   :  { %11587 = vsyncadd [#allocation3], 4294967264 }
 0xc52   :  { %10092 = vsyncpa [#allocation3], 1 }

</bundles_post_ra>
